<compile_context>
chip_gen: v6e
topology: v6e:2x2x1
jax: 0.10.0
libtpu: 0.0.40
codegen_flags: <defaults>
</compile_context>

<pallas_src>
import math

import jax
import jax.numpy as jnp
import numpy as np
from jax import lax
from jax.experimental import pallas as pl
from jax.experimental.pallas import tpu as pltpu

D_MODEL = 32
NUM_HEADS = 4
FF_DIM = 64
HEAD_DIM = D_MODEL // NUM_HEADS
LN_EPS = 1e-5
ATTN_SCALE = 1.0 / math.sqrt(HEAD_DIM)
LANES = 128

# bf16 operands are full-rate on the MXU of v5e/v6e/v7x (f32 operands are
# decomposed into multiple passes).  Accumulation is always f32.
MATMUL_DTYPE = jnp.bfloat16


# ---------------------------------------------------------------------------
# In-kernel math helpers (pure jnp / lax, traced inside the Pallas kernel body)
# ---------------------------------------------------------------------------
def _mm(a, b):
    return jnp.dot(a.astype(MATMUL_DTYPE), b.astype(MATMUL_DTYPE),
                   preferred_element_type=jnp.float32)


def _mm_bt(a, b):
    """a @ b.T without materializing the transpose (contract last dims)."""
    return lax.dot_general(a.astype(MATMUL_DTYPE), b.astype(MATMUL_DTYPE),
                           (((1,), (1,)), ((), ())),
                           preferred_element_type=jnp.float32)


def _layer_norm(h, gamma, beta):
    mean = jnp.mean(h, axis=-1, keepdims=True)
    var = jnp.mean(jnp.square(h - mean), axis=-1, keepdims=True)
    return (h - mean) * lax.rsqrt(var + LN_EPS) * gamma + beta


# ---------------------------------------------------------------------------
# Hoisted constants (attention masks etc.) + lane-dense parameter slab packing
# ---------------------------------------------------------------------------
def _round8(n):
    return -(-n // 8) * 8


def _build_constants(bt, s_dec, s_enc):
    """Head-stack lane masks, block-diagonal softmax-sum matrices, add-biases.

    Rows of the flattened activation tile are batch-major, so "same batch"
    is row//S == col//S and within a batch causal order == flat-row order.
    """
    r_dec, r_enc = bt * s_dec, bt * s_enc

    def head_stack_mask(r_kv):
        hm = np.zeros((NUM_HEADS * r_kv, D_MODEL), np.float32)
        for h in range(NUM_HEADS):
            hm[h * r_kv:(h + 1) * r_kv, h * HEAD_DIM:(h + 1) * HEAD_DIM] = 1.0
        return hm

    def block_ones(r_kv):
        return np.kron(np.eye(NUM_HEADS, dtype=np.float32),
                       np.ones((r_kv, r_kv), np.float32))

    ri = np.arange(r_dec)[:, None]
    ci = np.arange(r_dec)[None, :]
    self_bias = np.where((ri // s_dec == ci // s_dec) & (ri >= ci),
                         0.0, -1e9).astype(np.float32)
    cj = np.arange(r_enc)[None, :]
    cross_bias = np.where(ri // s_dec == cj // s_enc,
                          0.0, -1e9).astype(np.float32)

    return {
        "hm_self": head_stack_mask(r_dec),
        "hm_cross": head_stack_mask(r_enc),
        "blk_self": block_ones(r_dec),
        "blk_cross": block_ones(r_enc),
        "bias_self": np.tile(self_bias, (1, NUM_HEADS)),
        "bias_cross": np.tile(cross_bias, (1, NUM_HEADS)),
    }


def _pack_slab(entries):
    """Pack named 2-D f32 arrays into one lane-dense (rows, k*128) slab.

    Each entry starts at an 8-row-aligned offset and column 0, so in-kernel
    reads are free static slices.  Returns (slab, layout) with
    layout[name] = (row_offset, (rows, cols)).
    """
    width = LANES * max(1, max(-(-a.shape[1] // LANES) for a in entries.values()))
    layout = {}
    off = 0
    for name, a in entries.items():
        assert a.ndim == 2 and a.shape[1] <= width
        layout[name] = (off, tuple(a.shape))
        off += _round8(a.shape[0])
    slab = jnp.zeros((off, width), jnp.float32)
    for name, a in entries.items():
        r0, (r, c) = layout[name]
        slab = slab.at[r0:r0 + r, :c].set(jnp.asarray(a, jnp.float32))
    return slab, layout


# ---------------------------------------------------------------------------
# Pallas kernel factory (bt = batch elements per grid step)
# ---------------------------------------------------------------------------
def _make_kernel(layout, bt, s_dec, s_enc):
    r_dec = bt * s_dec

    def kernel(x_ref, enc_ref, slab_ref, out_ref):
        def param(name):
            r0, (r, c) = layout[name]
            return slab_ref[r0:r0 + r, :c]          # static slice: free

        x = x_ref[...]            # (bt*S, D)
        enc = enc_ref[...]        # (bt*S_enc, D)
        g = param("gamma")        # (1, D)
        b = param("beta")         # (1, D)

        def mha(q, k, v, wo, bo, hm, blk, bias):
            """All heads fused into 4 wide MXU matmuls.

            k_stack/v_stack stack the 4 head-masked copies along rows, so one
            q @ k_stack.T yields all per-head score blocks side by side; the
            block-diagonal ones matmul broadcasts each head's softmax sum over
            its 16-column block; (v_stack @ Wo) stacks v_h @ Wo_h so a single
            P @ VWo accumulates the output projection over heads.
            """
            k_stack = jnp.concatenate([k] * NUM_HEADS, axis=0) * hm
            v_stack = jnp.concatenate([v] * NUM_HEADS, axis=0) * hm
            s = _mm_bt(q, k_stack) + bias                      # (R, H*R_kv)
            m = jnp.max(s, axis=-1, keepdims=True)             # shared row shift
            e = jnp.exp(s - m)
            denom = _mm(e, blk)                                 # per-head sums
            p = e * pl.reciprocal(denom, approx=True)
            vwo = _mm(v_stack, wo)                              # stacked v_h @ Wo_h
            return _mm(p, vwo) + bo

        # ---- masked (causal) self-attention + residual + LN ----------------
        qkv = _mm(x, param("wqkv_s")) + param("bqkv_s")         # fused Q|K|V
        q = qkv[:, :D_MODEL] * ATTN_SCALE                       # scale folded once
        k = qkv[:, D_MODEL:2 * D_MODEL]
        v = qkv[:, 2 * D_MODEL:]
        attn = mha(q, k, v, param("swo"), param("sbo"),
                   param("hm_self"), param("blk_self"), param("bias_self"))
        # TODO(synk): nn.Dropout(0.1) treated as identity (inference mode).
        h1 = _layer_norm(x + attn, g, b)

        # ---- cross-attention: q from decoder, fused K|V from encoder -------
        qc = (_mm(h1, param("cwq")) + param("cbq")) * ATTN_SCALE
        kv = _mm(enc, param("wkv_c")) + param("bkv_c")
        kc = kv[:, :D_MODEL]
        vc = kv[:, D_MODEL:]
        attn_c = mha(qc, kc, vc, param("cwo"), param("cbo"),
                     param("hm_cross"), param("blk_cross"), param("bias_cross"))
        h2 = _layer_norm(h1 + attn_c, g, b)

        # ---- FFN + residual + LN --------------------------------------------
        f = jnp.maximum(_mm(h2, param("w1")) + param("b1"), 0.0)
        f = _mm(f, param("w2")) + param("b2")
        out = _layer_norm(h2 + f, g, b)

        # Lane-dense (unmasked) store: pad the 32 data lanes up to 128.
        pad = jnp.zeros((r_dec, LANES - D_MODEL), jnp.float32)
        out_ref[...] = jnp.concatenate([out, pad], axis=1)

    return kernel


# ---------------------------------------------------------------------------
# Wrapper
# ---------------------------------------------------------------------------
def _pick_batch_tile(batch, seq, target_rows=256):
    """Largest divisor of `batch` keeping rows-per-step <= target, with a
    megacore gate: for large problems keep >=2 grid steps so v7x's two
    TensorCores both get work."""
    bt = 1
    for cand in range(1, batch + 1):
        if batch % cand == 0 and cand * seq <= max(target_rows, seq):
            bt = cand
    if batch > 1 and batch * seq >= 256 and bt == batch:
        for cand in range(batch // 2, 0, -1):
            if batch % cand == 0:
                bt = cand
                break
    return bt


def decoder_block(x, enc, params):
    B, S, D = x.shape
    _, S_enc, _ = enc.shape
    assert D == D_MODEL

    bt = _pick_batch_tile(B, S)
    grid = (B // bt,)

    # Parameter prep (pure JAX, outside the kernel): fuse projections, then
    # pack everything (incl. hoisted masks/constants) into one lane-dense slab.
    entries = {
        "wqkv_s": jnp.concatenate([params["swq"], params["swk"], params["swv"]], axis=1),
        "bqkv_s": jnp.concatenate([params["sbq"], params["sbk"], params["sbv"]], axis=1),
        "swo": params["swo"], "sbo": params["sbo"],
        "cwq": params["cwq"], "cbq": params["cbq"],
        "wkv_c": jnp.concatenate([params["cwk"], params["cwv"]], axis=1),
        "bkv_c": jnp.concatenate([params["cbk"], params["cbv"]], axis=1),
        "cwo": params["cwo"], "cbo": params["cbo"],
        "w1": params["w1"], "b1": params["b1"],
        "w2": params["w2"], "b2": params["b2"],
        "gamma": params["gamma"], "beta": params["beta"],
    }
    entries.update(_build_constants(bt, S, S_enc))
    slab, layout = _pack_slab(entries)

    # Flatten (B, S, D) -> (B*S, D); each grid step handles bt whole batch
    # elements (bt*S rows).  At B=2, S=8 the grid collapses to a single step.
    x2 = x.reshape(B * S, D)
    e2 = enc.reshape(B * S_enc, D)

    x_spec = pl.BlockSpec((bt * S, D), lambda i: (i, 0))
    e_spec = pl.BlockSpec((bt * S_enc, D), lambda i: (i, 0))
    slab_spec = pl.BlockSpec(slab.shape, lambda i: (0, 0))
    out_spec = pl.BlockSpec((bt * S, LANES), lambda i: (i, 0))

    kernel = _make_kernel(layout, bt, S, S_enc)

    out_padded = pl.pallas_call(
        kernel,
        out_shape=jax.ShapeDtypeStruct((B * S, LANES), jnp.float32),
        grid_spec=pltpu.PrefetchScalarGridSpec(
            num_scalar_prefetch=0,
            grid=grid,
            in_specs=[x_spec, e_spec, slab_spec],
            out_specs=out_spec,
        ),
        compiler_params=pltpu.CompilerParams(
            dimension_semantics=("parallel",)),
    )(x2, e2, slab)

    return out_padded[:, :D].reshape(B, S, D)


# ---------------------------------------------------------------------------
# Deterministic parameter init + pure-JAX reference for verification
# ---------------------------------------------------------------------------
def init_params(key):
    keys = jax.random.split(key, 32)
    it = iter(keys)

    def lin(fan_in, fan_out):
        w = jax.random.normal(next(it), (fan_in, fan_out), jnp.float32) * 0.05
        b = jax.random.normal(next(it), (1, fan_out), jnp.float32) * 0.05
        return w, b

    p = {}
    for name in ("s", "c"):
        for proj in ("q", "k", "v", "o"):
            p[f"{name}w{proj}"], p[f"{name}b{proj}"] = lin(D_MODEL, D_MODEL)
    p["w1"], p["b1"] = lin(D_MODEL, FF_DIM)
    p["w2"], p["b2"] = lin(FF_DIM, D_MODEL)
    p["gamma"] = jnp.ones((1, D_MODEL), jnp.float32)
    p["beta"] = jnp.zeros((1, D_MODEL), jnp.float32)
    return p


def _ref_layer_norm(h, g, b):
    mean = jnp.mean(h, axis=-1, keepdims=True)
    var = jnp.mean(jnp.square(h - mean), axis=-1, keepdims=True)
    return (h - mean) / jnp.sqrt(var + LN_EPS) * g + b


def _ref_mha(xq, xkv, wq, bq, wk, bk, wv, bv, wo, bo, causal):
    q = xq @ wq + bq[0]
    k = xkv @ wk + bk[0]
    v = xkv @ wv + bv[0]
    sq, skv = xq.shape[0], xkv.shape[0]
    heads = []
    for h in range(NUM_HEADS):
        sl = slice(h * HEAD_DIM, (h + 1) * HEAD_DIM)
        s = (q[:, sl] @ k[:, sl].T) * ATTN_SCALE
        if causal:
            mask = np.tril(np.ones((sq, skv), dtype=bool))
            s = jnp.where(mask, s, -jnp.inf)
        p = jax.nn.softmax(s, axis=-1)
        heads.append(p @ v[:, sl])
    return jnp.concatenate(heads, axis=-1) @ wo + bo[0]


def reference_decoder_block(x, enc, p):
    def one(xb, eb):
        g, b = p["gamma"][0], p["beta"][0]
        m = _ref_mha(xb, xb, p["swq"], p["sbq"], p["swk"], p["sbk"],
                     p["swv"], p["sbv"], p["swo"], p["sbo"], causal=True)
        n1 = _ref_layer_norm(xb + m, g, b)
        c = _ref_mha(n1, eb, p["cwq"], p["cbq"], p["cwk"], p["cbk"],
                     p["cwv"], p["cbv"], p["cwo"], p["cbo"], causal=False)
        n2 = _ref_layer_norm(n1 + c, g, b)
        h = jnp.maximum(n2 @ p["w1"] + p["b1"][0], 0.0)
        f = h @ p["w2"] + p["b2"][0]
        return _ref_layer_norm(n2 + f, g, b)

    return jax.vmap(one)(x, enc)


if __name__ == "__main__":
    key = jax.random.PRNGKey(0)
    k_x, k_e, k_p = jax.random.split(key, 3)

    B, S, S_ENC = 2, 8, 8
    x = jax.random.normal(k_x, (B, S, D_MODEL), jnp.float32)
    enc = jax.random.normal(k_e, (B, S_ENC, D_MODEL), jnp.float32)
    params = init_params(k_p)

    out = jax.block_until_ready(decoder_block(x, enc, params))
    ref = jax.block_until_ready(reference_decoder_block(x, enc, params))

    # Tolerance accommodates bf16 MXU operands + pl.reciprocal(approx=True).
    np.testing.assert_allclose(np.asarray(out), np.asarray(ref),
                               rtol=2e-2, atol=2e-2)
    print("KERNEL_OK")
</pallas_src>

<mosaic_0001>
module attributes {stable_mosaic.version = 11 : i64} {
  func.func @kernel(%arg0: i32, %arg1: memref<16x32xf32, #tpu.memory_space<vmem>>, %arg2: memref<16x32xf32, #tpu.memory_space<vmem>>, %arg3: memref<616x128xf32, #tpu.memory_space<vmem>>, %arg4: memref<16x128xf32, #tpu.memory_space<vmem>>) attributes {dimension_semantics = [#tpu.dimension_semantics<parallel>], iteration_bounds = array<i64: 1>, scalar_prefetch = 0 : i64, scratch_operands = 0 : i64, tpu.core_type = #tpu.core_type<tc>, window_params = [{transform_indices = @transform_0, window_bounds = array<i64: 16, 32>}, {transform_indices = @transform_1, window_bounds = array<i64: 16, 32>}, {pipeline_mode = #tpu.pipeline_mode<synchronous>, transform_indices = @transform_2, window_bounds = array<i64: 616, 128>}, {transform_indices = @transform_3, window_bounds = array<i64: 16, 128>}]} {
    %c0 = arith.constant 0 : index
    %c0_0 = arith.constant 0 : index
    %0 = vector.load %arg1[%c0, %c0_0] : memref<16x32xf32, #tpu.memory_space<vmem>>, vector<16x32xf32>
    %c0_1 = arith.constant 0 : index
    %c0_2 = arith.constant 0 : index
    %1 = vector.load %arg2[%c0_1, %c0_2] : memref<16x32xf32, #tpu.memory_space<vmem>>, vector<16x32xf32>
    %c312 = arith.constant 312 : index
    %c0_3 = arith.constant 0 : index
    %2 = vector.load %arg3[%c312, %c0_3] : memref<616x128xf32, #tpu.memory_space<vmem>>, vector<1x32xf32>
    %c320 = arith.constant 320 : index
    %c0_4 = arith.constant 0 : index
    %3 = vector.load %arg3[%c320, %c0_4] : memref<616x128xf32, #tpu.memory_space<vmem>>, vector<1x32xf32>
    %c0_5 = arith.constant 0 : index
    %c0_6 = arith.constant 0 : index
    %4 = vector.load %arg3[%c0_5, %c0_6] : memref<616x128xf32, #tpu.memory_space<vmem>>, vector<32x96xf32>
    %5 = arith.truncf %0 : vector<16x32xf32> to vector<16x32xbf16>
    %6 = arith.truncf %4 : vector<32x96xf32> to vector<32x96xbf16>
    %cst = arith.constant dense<0.000000e+00> : vector<16x96xf32>
    %7 = tpu.matmul %5, %6, %cst {dimension_numbers = #tpu.dot_dimension_numbers<[1], [0], [0], [1], [0, 0, 1, 1], [], []>} : vector<16x32xbf16>, vector<32x96xbf16>, vector<16x96xf32> -> vector<16x96xf32>
    %c32 = arith.constant 32 : index
    %c0_7 = arith.constant 0 : index
    %8 = vector.load %arg3[%c32, %c0_7] : memref<616x128xf32, #tpu.memory_space<vmem>>, vector<1x96xf32>
    %9 = vector.broadcast %8 : vector<1x96xf32> to vector<16x96xf32>
    %10 = arith.addf %7, %9 : vector<16x96xf32>
    %11 = vector.extract_strided_slice %10 {offsets = [0, 0], sizes = [16, 32], strides = [1, 1]} : vector<16x96xf32> to vector<16x32xf32>
    %cst_8 = arith.constant 0.353553385 : f32
    %12 = vector.broadcast %cst_8 : f32 to vector<16x32xf32>
    %13 = arith.mulf %11, %12 : vector<16x32xf32>
    %14 = vector.extract_strided_slice %10 {offsets = [0, 32], sizes = [16, 32], strides = [1, 1]} : vector<16x96xf32> to vector<16x32xf32>
    %15 = vector.extract_strided_slice %10 {offsets = [0, 64], sizes = [16, 32], strides = [1, 1]} : vector<16x96xf32> to vector<16x32xf32>
    %c40 = arith.constant 40 : index
    %c0_9 = arith.constant 0 : index
    %16 = vector.load %arg3[%c40, %c0_9] : memref<616x128xf32, #tpu.memory_space<vmem>>, vector<32x32xf32>
    %c72 = arith.constant 72 : index
    %c0_10 = arith.constant 0 : index
    %17 = vector.load %arg3[%c72, %c0_10] : memref<616x128xf32, #tpu.memory_space<vmem>>, vector<1x32xf32>
    %c328 = arith.constant 328 : index
    %c0_11 = arith.constant 0 : index
    %18 = vector.load %arg3[%c328, %c0_11] : memref<616x128xf32, #tpu.memory_space<vmem>>, vector<64x32xf32>
    %c456 = arith.constant 456 : index
    %c0_12 = arith.constant 0 : index
    %19 = vector.load %arg3[%c456, %c0_12] : memref<616x128xf32, #tpu.memory_space<vmem>>, vector<64x64xf32>
    %c584 = arith.constant 584 : index
    %c0_13 = arith.constant 0 : index
    %20 = vector.load %arg3[%c584, %c0_13] : memref<616x128xf32, #tpu.memory_space<vmem>>, vector<16x64xf32>
    %21 = tpu.concatenate %14, %14, %14, %14 in 0 : vector<16x32xf32>, vector<16x32xf32>, vector<16x32xf32>, vector<16x32xf32> -> vector<64x32xf32>
    %22 = arith.mulf %21, %18 : vector<64x32xf32>
    %23 = tpu.concatenate %15, %15, %15, %15 in 0 : vector<16x32xf32>, vector<16x32xf32>, vector<16x32xf32>, vector<16x32xf32> -> vector<64x32xf32>
    %24 = arith.mulf %23, %18 : vector<64x32xf32>
    %25 = arith.truncf %13 : vector<16x32xf32> to vector<16x32xbf16>
    %26 = arith.truncf %22 : vector<64x32xf32> to vector<64x32xbf16>
    %cst_14 = arith.constant dense<0.000000e+00> : vector<16x64xf32>
    %27 = tpu.matmul %25, %26, %cst_14 {dimension_numbers = #tpu.dot_dimension_numbers<[1], [1], [0], [0], [0, 0, 1, 0], [], []>} : vector<16x32xbf16>, vector<64x32xbf16>, vector<16x64xf32> -> vector<16x64xf32>
    %28 = arith.addf %27, %20 : vector<16x64xf32>
    %cst_15 = arith.constant dense<0xFF800000> : vector<16xf32>
    %29 = vector.multi_reduction <maximumf>, %28, %cst_15 [1] : vector<16x64xf32> to vector<16xf32>
    %30 = vector.shape_cast %29 : vector<16xf32> to vector<16x1xf32>
    %31 = vector.broadcast %30 : vector<16x1xf32> to vector<16x64xf32>
    %32 = arith.subf %28, %31 : vector<16x64xf32>
    %33 = math.exp %32 : vector<16x64xf32>
    %34 = arith.truncf %33 : vector<16x64xf32> to vector<16x64xbf16>
    %35 = arith.truncf %19 : vector<64x64xf32> to vector<64x64xbf16>
    %cst_16 = arith.constant dense<0.000000e+00> : vector<16x64xf32>
    %36 = tpu.matmul %34, %35, %cst_16 {dimension_numbers = #tpu.dot_dimension_numbers<[1], [0], [0], [1], [0, 0, 1, 1], [], []>} : vector<16x64xbf16>, vector<64x64xbf16>, vector<16x64xf32> -> vector<16x64xf32>
    %37 = tpu.reciprocal %36 {approx = true} : vector<16x64xf32> -> vector<16x64xf32>
    %38 = arith.mulf %33, %37 : vector<16x64xf32>
    %39 = arith.truncf %24 : vector<64x32xf32> to vector<64x32xbf16>
    %40 = arith.truncf %16 : vector<32x32xf32> to vector<32x32xbf16>
    %cst_17 = arith.constant dense<0.000000e+00> : vector<64x32xf32>
    %41 = tpu.matmul %39, %40, %cst_17 {dimension_numbers = #tpu.dot_dimension_numbers<[1], [0], [0], [1], [0, 0, 1, 1], [], []>} : vector<64x32xbf16>, vector<32x32xbf16>, vector<64x32xf32> -> vector<64x32xf32>
    %42 = arith.truncf %38 : vector<16x64xf32> to vector<16x64xbf16>
    %43 = arith.truncf %41 : vector<64x32xf32> to vector<64x32xbf16>
    %cst_18 = arith.constant dense<0.000000e+00> : vector<16x32xf32>
    %44 = tpu.matmul %42, %43, %cst_18 {dimension_numbers = #tpu.dot_dimension_numbers<[1], [0], [0], [1], [0, 0, 1, 1], [], []>} : vector<16x64xbf16>, vector<64x32xbf16>, vector<16x32xf32> -> vector<16x32xf32>
    %45 = vector.broadcast %17 : vector<1x32xf32> to vector<16x32xf32>
    %46 = arith.addf %44, %45 : vector<16x32xf32>
    %47 = arith.addf %0, %46 : vector<16x32xf32>
    %cst_19 = arith.constant dense<0.000000e+00> : vector<16xf32>
    %48 = vector.multi_reduction <add>, %47, %cst_19 [1] : vector<16x32xf32> to vector<16xf32>
    %49 = vector.shape_cast %48 : vector<16xf32> to vector<16x1xf32>
    %cst_20 = arith.constant 3.200000e+01 : f32
    %50 = vector.broadcast %cst_20 : f32 to vector<16x1xf32>
    %51 = arith.divf %49, %50 : vector<16x1xf32>
    %52 = vector.broadcast %51 : vector<16x1xf32> to vector<16x32xf32>
    %53 = arith.subf %47, %52 : vector<16x32xf32>
    %54 = arith.mulf %53, %53 : vector<16x32xf32>
    %cst_21 = arith.constant dense<0.000000e+00> : vector<16xf32>
    %55 = vector.multi_reduction <add>, %54, %cst_21 [1] : vector<16x32xf32> to vector<16xf32>
    %56 = vector.shape_cast %55 : vector<16xf32> to vector<16x1xf32>
    %cst_22 = arith.constant 3.200000e+01 : f32
    %57 = vector.broadcast %cst_22 : f32 to vector<16x1xf32>
    %58 = arith.divf %56, %57 : vector<16x1xf32>
    %59 = vector.broadcast %51 : vector<16x1xf32> to vector<16x32xf32>
    %60 = arith.subf %47, %59 : vector<16x32xf32>
    %cst_23 = arith.constant 9.99999974E-6 : f32
    %61 = vector.broadcast %cst_23 : f32 to vector<16x1xf32>
    %62 = arith.addf %58, %61 : vector<16x1xf32>
    %63 = math.rsqrt %62 : vector<16x1xf32>
    %64 = vector.broadcast %63 : vector<16x1xf32> to vector<16x32xf32>
    %65 = arith.mulf %60, %64 : vector<16x32xf32>
    %66 = vector.broadcast %2 : vector<1x32xf32> to vector<16x32xf32>
    %67 = arith.mulf %65, %66 : vector<16x32xf32>
    %68 = vector.broadcast %3 : vector<1x32xf32> to vector<16x32xf32>
    %69 = arith.addf %67, %68 : vector<16x32xf32>
    %c80 = arith.constant 80 : index
    %c0_24 = arith.constant 0 : index
    %70 = vector.load %arg3[%c80, %c0_24] : memref<616x128xf32, #tpu.memory_space<vmem>>, vector<32x32xf32>
    %71 = arith.truncf %69 : vector<16x32xf32> to vector<16x32xbf16>
    %72 = arith.truncf %70 : vector<32x32xf32> to vector<32x32xbf16>
    %cst_25 = arith.constant dense<0.000000e+00> : vector<16x32xf32>
    %73 = tpu.matmul %71, %72, %cst_25 {dimension_numbers = #tpu.dot_dimension_numbers<[1], [0], [0], [1], [0, 0, 1, 1], [], []>} : vector<16x32xbf16>, vector<32x32xbf16>, vector<16x32xf32> -> vector<16x32xf32>
    %c112 = arith.constant 112 : index
    %c0_26 = arith.constant 0 : index
    %74 = vector.load %arg3[%c112, %c0_26] : memref<616x128xf32, #tpu.memory_space<vmem>>, vector<1x32xf32>
    %75 = vector.broadcast %74 : vector<1x32xf32> to vector<16x32xf32>
    %76 = arith.addf %73, %75 : vector<16x32xf32>
    %cst_27 = arith.constant 0.353553385 : f32
    %77 = vector.broadcast %cst_27 : f32 to vector<16x32xf32>
    %78 = arith.mulf %76, %77 : vector<16x32xf32>
    %c120 = arith.constant 120 : index
    %c0_28 = arith.constant 0 : index
    %79 = vector.load %arg3[%c120, %c0_28] : memref<616x128xf32, #tpu.memory_space<vmem>>, vector<32x64xf32>
    %80 = arith.truncf %1 : vector<16x32xf32> to vector<16x32xbf16>
    %81 = arith.truncf %79 : vector<32x64xf32> to vector<32x64xbf16>
    %cst_29 = arith.constant dense<0.000000e+00> : vector<16x64xf32>
    %82 = tpu.matmul %80, %81, %cst_29 {dimension_numbers = #tpu.dot_dimension_numbers<[1], [0], [0], [1], [0, 0, 1, 1], [], []>} : vector<16x32xbf16>, vector<32x64xbf16>, vector<16x64xf32> -> vector<16x64xf32>
    %c152 = arith.constant 152 : index
    %c0_30 = arith.constant 0 : index
    %83 = vector.load %arg3[%c152, %c0_30] : memref<616x128xf32, #tpu.memory_space<vmem>>, vector<1x64xf32>
    %84 = vector.broadcast %83 : vector<1x64xf32> to vector<16x64xf32>
    %85 = arith.addf %82, %84 : vector<16x64xf32>
    %86 = vector.extract_strided_slice %85 {offsets = [0, 0], sizes = [16, 32], strides = [1, 1]} : vector<16x64xf32> to vector<16x32xf32>
    %87 = vector.extract_strided_slice %85 {offsets = [0, 32], sizes = [16, 32], strides = [1, 1]} : vector<16x64xf32> to vector<16x32xf32>
    %c160 = arith.constant 160 : index
    %c0_31 = arith.constant 0 : index
    %88 = vector.load %arg3[%c160, %c0_31] : memref<616x128xf32, #tpu.memory_space<vmem>>, vector<32x32xf32>
    %c192 = arith.constant 192 : index
    %c0_32 = arith.constant 0 : index
    %89 = vector.load %arg3[%c192, %c0_32] : memref<616x128xf32, #tpu.memory_space<vmem>>, vector<1x32xf32>
    %c392 = arith.constant 392 : index
    %c0_33 = arith.constant 0 : index
    %90 = vector.load %arg3[%c392, %c0_33] : memref<616x128xf32, #tpu.memory_space<vmem>>, vector<64x32xf32>
    %c520 = arith.constant 520 : index
    %c0_34 = arith.constant 0 : index
    %91 = vector.load %arg3[%c520, %c0_34] : memref<616x128xf32, #tpu.memory_space<vmem>>, vector<64x64xf32>
    %c600 = arith.constant 600 : index
    %c0_35 = arith.constant 0 : index
    %92 = vector.load %arg3[%c600, %c0_35] : memref<616x128xf32, #tpu.memory_space<vmem>>, vector<16x64xf32>
    %93 = tpu.concatenate %86, %86, %86, %86 in 0 : vector<16x32xf32>, vector<16x32xf32>, vector<16x32xf32>, vector<16x32xf32> -> vector<64x32xf32>
    %94 = arith.mulf %93, %90 : vector<64x32xf32>
    %95 = tpu.concatenate %87, %87, %87, %87 in 0 : vector<16x32xf32>, vector<16x32xf32>, vector<16x32xf32>, vector<16x32xf32> -> vector<64x32xf32>
    %96 = arith.mulf %95, %90 : vector<64x32xf32>
    %97 = arith.truncf %78 : vector<16x32xf32> to vector<16x32xbf16>
    %98 = arith.truncf %94 : vector<64x32xf32> to vector<64x32xbf16>
    %cst_36 = arith.constant dense<0.000000e+00> : vector<16x64xf32>
    %99 = tpu.matmul %97, %98, %cst_36 {dimension_numbers = #tpu.dot_dimension_numbers<[1], [1], [0], [0], [0, 0, 1, 0], [], []>} : vector<16x32xbf16>, vector<64x32xbf16>, vector<16x64xf32> -> vector<16x64xf32>
    %100 = arith.addf %99, %92 : vector<16x64xf32>
    %cst_37 = arith.constant dense<0xFF800000> : vector<16xf32>
    %101 = vector.multi_reduction <maximumf>, %100, %cst_37 [1] : vector<16x64xf32> to vector<16xf32>
    %102 = vector.shape_cast %101 : vector<16xf32> to vector<16x1xf32>
    %103 = vector.broadcast %102 : vector<16x1xf32> to vector<16x64xf32>
    %104 = arith.subf %100, %103 : vector<16x64xf32>
    %105 = math.exp %104 : vector<16x64xf32>
    %106 = arith.truncf %105 : vector<16x64xf32> to vector<16x64xbf16>
    %107 = arith.truncf %91 : vector<64x64xf32> to vector<64x64xbf16>
    %cst_38 = arith.constant dense<0.000000e+00> : vector<16x64xf32>
    %108 = tpu.matmul %106, %107, %cst_38 {dimension_numbers = #tpu.dot_dimension_numbers<[1], [0], [0], [1], [0, 0, 1, 1], [], []>} : vector<16x64xbf16>, vector<64x64xbf16>, vector<16x64xf32> -> vector<16x64xf32>
    %109 = tpu.reciprocal %108 {approx = true} : vector<16x64xf32> -> vector<16x64xf32>
    %110 = arith.mulf %105, %109 : vector<16x64xf32>
    %111 = arith.truncf %96 : vector<64x32xf32> to vector<64x32xbf16>
    %112 = arith.truncf %88 : vector<32x32xf32> to vector<32x32xbf16>
    %cst_39 = arith.constant dense<0.000000e+00> : vector<64x32xf32>
    %113 = tpu.matmul %111, %112, %cst_39 {dimension_numbers = #tpu.dot_dimension_numbers<[1], [0], [0], [1], [0, 0, 1, 1], [], []>} : vector<64x32xbf16>, vector<32x32xbf16>, vector<64x32xf32> -> vector<64x32xf32>
    %114 = arith.truncf %110 : vector<16x64xf32> to vector<16x64xbf16>
    %115 = arith.truncf %113 : vector<64x32xf32> to vector<64x32xbf16>
    %cst_40 = arith.constant dense<0.000000e+00> : vector<16x32xf32>
    %116 = tpu.matmul %114, %115, %cst_40 {dimension_numbers = #tpu.dot_dimension_numbers<[1], [0], [0], [1], [0, 0, 1, 1], [], []>} : vector<16x64xbf16>, vector<64x32xbf16>, vector<16x32xf32> -> vector<16x32xf32>
    %117 = vector.broadcast %89 : vector<1x32xf32> to vector<16x32xf32>
    %118 = arith.addf %116, %117 : vector<16x32xf32>
    %119 = arith.addf %69, %118 : vector<16x32xf32>
    %cst_41 = arith.constant dense<0.000000e+00> : vector<16xf32>
    %120 = vector.multi_reduction <add>, %119, %cst_41 [1] : vector<16x32xf32> to vector<16xf32>
    %121 = vector.shape_cast %120 : vector<16xf32> to vector<16x1xf32>
    %cst_42 = arith.constant 3.200000e+01 : f32
    %122 = vector.broadcast %cst_42 : f32 to vector<16x1xf32>
    %123 = arith.divf %121, %122 : vector<16x1xf32>
    %124 = vector.broadcast %123 : vector<16x1xf32> to vector<16x32xf32>
    %125 = arith.subf %119, %124 : vector<16x32xf32>
    %126 = arith.mulf %125, %125 : vector<16x32xf32>
    %cst_43 = arith.constant dense<0.000000e+00> : vector<16xf32>
    %127 = vector.multi_reduction <add>, %126, %cst_43 [1] : vector<16x32xf32> to vector<16xf32>
    %128 = vector.shape_cast %127 : vector<16xf32> to vector<16x1xf32>
    %cst_44 = arith.constant 3.200000e+01 : f32
    %129 = vector.broadcast %cst_44 : f32 to vector<16x1xf32>
    %130 = arith.divf %128, %129 : vector<16x1xf32>
    %131 = vector.broadcast %123 : vector<16x1xf32> to vector<16x32xf32>
    %132 = arith.subf %119, %131 : vector<16x32xf32>
    %cst_45 = arith.constant 9.99999974E-6 : f32
    %133 = vector.broadcast %cst_45 : f32 to vector<16x1xf32>
    %134 = arith.addf %130, %133 : vector<16x1xf32>
    %135 = math.rsqrt %134 : vector<16x1xf32>
    %136 = vector.broadcast %135 : vector<16x1xf32> to vector<16x32xf32>
    %137 = arith.mulf %132, %136 : vector<16x32xf32>
    %138 = vector.broadcast %2 : vector<1x32xf32> to vector<16x32xf32>
    %139 = arith.mulf %137, %138 : vector<16x32xf32>
    %140 = vector.broadcast %3 : vector<1x32xf32> to vector<16x32xf32>
    %141 = arith.addf %139, %140 : vector<16x32xf32>
    %c200 = arith.constant 200 : index
    %c0_46 = arith.constant 0 : index
    %142 = vector.load %arg3[%c200, %c0_46] : memref<616x128xf32, #tpu.memory_space<vmem>>, vector<32x64xf32>
    %143 = arith.truncf %141 : vector<16x32xf32> to vector<16x32xbf16>
    %144 = arith.truncf %142 : vector<32x64xf32> to vector<32x64xbf16>
    %cst_47 = arith.constant dense<0.000000e+00> : vector<16x64xf32>
    %145 = tpu.matmul %143, %144, %cst_47 {dimension_numbers = #tpu.dot_dimension_numbers<[1], [0], [0], [1], [0, 0, 1, 1], [], []>} : vector<16x32xbf16>, vector<32x64xbf16>, vector<16x64xf32> -> vector<16x64xf32>
    %c232 = arith.constant 232 : index
    %c0_48 = arith.constant 0 : index
    %146 = vector.load %arg3[%c232, %c0_48] : memref<616x128xf32, #tpu.memory_space<vmem>>, vector<1x64xf32>
    %147 = vector.broadcast %146 : vector<1x64xf32> to vector<16x64xf32>
    %148 = arith.addf %145, %147 : vector<16x64xf32>
    %cst_49 = arith.constant 0.000000e+00 : f32
    %149 = vector.broadcast %cst_49 : f32 to vector<16x64xf32>
    %150 = arith.maximumf %148, %149 : vector<16x64xf32>
    %c240 = arith.constant 240 : index
    %c0_50 = arith.constant 0 : index
    %151 = vector.load %arg3[%c240, %c0_50] : memref<616x128xf32, #tpu.memory_space<vmem>>, vector<64x32xf32>
    %152 = arith.truncf %150 : vector<16x64xf32> to vector<16x64xbf16>
    %153 = arith.truncf %151 : vector<64x32xf32> to vector<64x32xbf16>
    %cst_51 = arith.constant dense<0.000000e+00> : vector<16x32xf32>
    %154 = tpu.matmul %152, %153, %cst_51 {dimension_numbers = #tpu.dot_dimension_numbers<[1], [0], [0], [1], [0, 0, 1, 1], [], []>} : vector<16x64xbf16>, vector<64x32xbf16>, vector<16x32xf32> -> vector<16x32xf32>
    %c304 = arith.constant 304 : index
    %c0_52 = arith.constant 0 : index
    %155 = vector.load %arg3[%c304, %c0_52] : memref<616x128xf32, #tpu.memory_space<vmem>>, vector<1x32xf32>
    %156 = vector.broadcast %155 : vector<1x32xf32> to vector<16x32xf32>
    %157 = arith.addf %154, %156 : vector<16x32xf32>
    %158 = arith.addf %141, %157 : vector<16x32xf32>
    %cst_53 = arith.constant dense<0.000000e+00> : vector<16xf32>
    %159 = vector.multi_reduction <add>, %158, %cst_53 [1] : vector<16x32xf32> to vector<16xf32>
    %160 = vector.shape_cast %159 : vector<16xf32> to vector<16x1xf32>
    %cst_54 = arith.constant 3.200000e+01 : f32
    %161 = vector.broadcast %cst_54 : f32 to vector<16x1xf32>
    %162 = arith.divf %160, %161 : vector<16x1xf32>
    %163 = vector.broadcast %162 : vector<16x1xf32> to vector<16x32xf32>
    %164 = arith.subf %158, %163 : vector<16x32xf32>
    %165 = arith.mulf %164, %164 : vector<16x32xf32>
    %cst_55 = arith.constant dense<0.000000e+00> : vector<16xf32>
    %166 = vector.multi_reduction <add>, %165, %cst_55 [1] : vector<16x32xf32> to vector<16xf32>
    %167 = vector.shape_cast %166 : vector<16xf32> to vector<16x1xf32>
    %cst_56 = arith.constant 3.200000e+01 : f32
    %168 = vector.broadcast %cst_56 : f32 to vector<16x1xf32>
    %169 = arith.divf %167, %168 : vector<16x1xf32>
    %170 = vector.broadcast %162 : vector<16x1xf32> to vector<16x32xf32>
    %171 = arith.subf %158, %170 : vector<16x32xf32>
    %cst_57 = arith.constant 9.99999974E-6 : f32
    %172 = vector.broadcast %cst_57 : f32 to vector<16x1xf32>
    %173 = arith.addf %169, %172 : vector<16x1xf32>
    %174 = math.rsqrt %173 : vector<16x1xf32>
    %175 = vector.broadcast %174 : vector<16x1xf32> to vector<16x32xf32>
    %176 = arith.mulf %171, %175 : vector<16x32xf32>
    %177 = vector.broadcast %2 : vector<1x32xf32> to vector<16x32xf32>
    %178 = arith.mulf %176, %177 : vector<16x32xf32>
    %179 = vector.broadcast %3 : vector<1x32xf32> to vector<16x32xf32>
    %180 = arith.addf %178, %179 : vector<16x32xf32>
    %cst_58 = arith.constant 0.000000e+00 : f32
    %181 = vector.broadcast %cst_58 : f32 to vector<16x96xf32>
    %182 = tpu.concatenate %180, %181 in 1 : vector<16x32xf32>, vector<16x96xf32> -> vector<16x128xf32>
    %c0_59 = arith.constant 0 : index
    %c0_60 = arith.constant 0 : index
    %183 = vector.load %arg4[%c0_59, %c0_60] : memref<16x128xf32, #tpu.memory_space<vmem>>, vector<16x128xf32>
    tpu.vector_store %arg4[%c0_59, %c0_60], %182 {strides = array<i32>} : memref<16x128xf32, #tpu.memory_space<vmem>>, vector<16x128xf32>,
    return
  }
  func.func @transform_0(%arg0: i32) -> (i32, i32) {
    %c0_i32 = arith.constant 0 : i32
    %c0_i32_0 = arith.constant 0 : i32
    return %arg0, %c0_i32 : i32, i32
  }
  func.func @transform_1(%arg0: i32) -> (i32, i32) {
    %c0_i32 = arith.constant 0 : i32
    %c0_i32_0 = arith.constant 0 : i32
    return %arg0, %c0_i32 : i32, i32
  }
  func.func @transform_2(%arg0: i32) -> (i32, i32) {
    %c0_i32 = arith.constant 0 : i32
    %c0_i32_0 = arith.constant 0 : i32
    %c0_i32_1 = arith.constant 0 : i32
    return %c0_i32, %c0_i32_0 : i32, i32
  }
  func.func @transform_3(%arg0: i32) -> (i32, i32) {
    %c0_i32 = arith.constant 0 : i32
    %c0_i32_0 = arith.constant 0 : i32
    return %arg0, %c0_i32 : i32, i32
  }
}

</mosaic_0001>

<bundles_post_ra>
// kernel: tpu_custom_call.1
= control target key start
LH: loop header
LB: loop body
LE: loop exit
PB: predicated region body
PF: predicated region fallthrough
CT: control target
= control target key end

     0   :  { %8 = vsyncpa [#allocation3], 0  ;;  %s1858_s0 = inlined_call_operand.hbm [shape: f32[16,32], index: 0, kind: input, shape index: {}]   ;;  %s1859_s1 = inlined_call_operand.hbm [shape: f32[16,32], index: 1, kind: input, shape index: {}]   ;;  %s1860_s2 = inlined_call_operand.hbm [shape: f32[616,128], index: 2, kind: input, shape index: {}]   ;;  %s1861_s3 = inlined_call_operand.hbm [shape: f32[16,128], index: 3, kind: output, shape index: {}]  }
   0x1   :  { %9 = vsyncpa [#allocation6], 0 }
   0x2   :  { %10 = vsyncpa [#allocation4], 0  ;;  %s1562_s12 = smov [#allocation5]   ;;  %s1563_s14 = smov [#allocation2]  }
   0x3   :  { %s28_s13 = sshll.u32 %s1562_s12, 4  ;;  %s16_s15 = sshll.u32 %s1563_s14, 4  ;;  %s29_s13 = int_to_ptr.vmem [resolvable:$true] %s28_s13  ;;  %s17_s15 = int_to_ptr.vmem [resolvable:$true] %s16_s15 }
   0x4   :  { %s1484_s16 = scalar_lea.vmem %s29_s13, 256  ;;  %p1489_p1 = scmp.lt.s32.totalorder %s29_s13, %s29_s13 }
   0x5   :  { %p1485_p0 = scmp.ne.s32.totalorder %s29_s13, %s1484_s16  ;;  %p1490_p2 = scmp.lt.s32.totalorder %s1484_s16, %s1484_s16 }
   0x7   :  { %p1491_p3 = por %p1490_p2, %p1489_p1 }
   0x9   :  { %p1492_p4 = pnand %p1491_p3, %p1485_p0 }
   0xb   :  { %1495 = shalt.err (!%p1492_p4)
}
   0xc   :  { %s1564_s17 = smov 128   ;;  %s1565_s18 = smov 8  }
   0xd   :  { %34 = dma.hbm_to_vmem [thread:$0]  %s1859_s1, 256, %s29_s13, [#allocation6], %s1564_s17, %s1564_s17, %s1565_s18  }
   0xe   :  { %s1504_s21 = scalar_lea.vmem %s17_s15, 256  ;;  %p1509_p6 = scmp.lt.s32.totalorder %s17_s15, %s17_s15 }
   0xf   :  { %p1505_p5 = scmp.ne.s32.totalorder %s17_s15, %s1504_s21  ;;  %p1510_p7 = scmp.lt.s32.totalorder %s1504_s21, %s1504_s21 }
  0x11   :  { %p1511_p8 = por %p1510_p7, %p1509_p6 }
  0x13   :  { %p1512_p9 = pnand %p1511_p8, %p1505_p5 }
  0x15   :  { %1515 = shalt.err (!%p1512_p9)
}
  0x16   :  { %22 = dma.hbm_to_vmem [thread:$0]  %s1858_s0, 256, %s17_s15, [#allocation3], %s1564_s17, %s1564_s17, %s1565_s18  }
  0x17   :  { %s1566_s24 = smov [#allocation7]  }
  0x18   :  { %s40_s25 = sshll.u32 %s1566_s24, 4  ;;  %s41_s25 = int_to_ptr.vmem [resolvable:$true] %s40_s25 }
  0x19   :  { %s1524_s26 = scalar_lea.vmem %s41_s25, 9856  ;;  %p1529_p11 = scmp.lt.s32.totalorder %s41_s25, %s41_s25 }
  0x1a   :  { %p1525_p10 = scmp.ne.s32.totalorder %s41_s25, %s1524_s26  ;;  %p1530_p12 = scmp.lt.s32.totalorder %s1524_s26, %s1524_s26 }
  0x1c   :  { %p1531_p13 = por %p1530_p12, %p1529_p11 }
  0x1e   :  { %p1532_p0 = pnand %p1531_p13, %p1525_p10 }
  0x20   :  { %1535 = shalt.err (!%p1532_p0)
}
  0x21   :  { %46 = dma.hbm_to_vmem [thread:$0]  %s1860_s2, 9856, %s41_s25, [#allocation6], %s1564_s17, %s1564_s17, %s1565_s18  }
  0x22   :  { %1556 = dma.done.wait [#allocation3], 256  }
  0x23   :  { %1557 = vsyncadd [#allocation3], 4294967040 }
  0x24   :  { %1558 = dma.done.wait [#allocation6], 10112  }
  0x25   :  { %1559 = vsyncadd [#allocation6], 4294957184  ;;  %v1567_v0 = vmov 0.0   ;;  %vm1568_vm0 = vmmov 0   ;;  %v65_v1 = vld [vmem:[#allocation7 + $0x10] sm:$0xff]  ;;  %v66_v2 = vld [vmem:[#allocation7 + $0x18] sm:$0xff] }
  0x26   :  { %1297 = vmatprep.subr.bf16.mxu1 %v1567_v0  ;;  %1301 = vmatprep.mubr.msk.bf16.mxu1 %vm1568_vm0, %v1567_v0  ;;  %v63_v3 = vld [vmem:[#allocation7] sm:$0xff]  ;;  %v69_v4 = vpack.c.bf16 %v66_v2, %v65_v1  ;;  %v64_v5 = vld [vmem:[#allocation7 + $0x8] sm:$0xff]  ;;  %v1617_v6 = vld [vmem:[#allocation7 + $0x178] sm:$0xff]  ;;  %s1569_s0 = smov 32   ;;  %vm75_vm1 = vcmask 261120   ;;  %s1570_s2 = smov 96  }
  0x27   :  { %1317 = vmatprep.subr.bf16.mxu0 %v1567_v0  ;;  %1325 = vmatprep.mubr.msk.bf16.mxu0 %vm1568_vm0, %v1567_v0  ;;  %v1619_v7 = vld [vmem:[#allocation7 + $0x168] sm:$0xff]  ;;  %v68_v8 = vpack.c.bf16 %v64_v5, %v63_v3  ;;  %v1621_v9 = vld [vmem:[#allocation2] sm:$0xff]  ;;  %v132_v12 = vld [vmem:[#allocation7 + $0x170] sm:$0xff]  ;;  %s1571_s28 = smov 64   ;;  %vm290_vm2 = vcmask 523264   ;;  %s1572_s29 = smov [#allocation8]  }
  0x28   :  { %1298 = vmatpush3.bf16.msra.mxu1 %v69_v4  ;;  %v1623_v10 = vld [vmem:[#allocation2 + $0x8] sm:$0xff]  ;;  %165 = vrot.lane.b32.xlu0 %v1617_v6, %s1569_s0  ;;  %v134_v11 = vld [vmem:[#allocation7 + $0x180] sm:$0xff]  ;;  %v129_v14 = vld [vmem:[#allocation7 + $0x158] sm:$0xff]  ;;  %s1197_s30 = sshll.u32 %s1572_s29, 4  ;;  %s1198_s30 = int_to_ptr.vmem [resolvable:$true] %s1197_s30 }
  0x29   :  { %1299 = vmatprep.subr.bf16.mxu1 %v1567_v0  ;;  %161 = vrot.lane.b32.xlu1 %v1619_v7, %s1569_s0  ;;  %v67_v13 = vpack.c.bf16 %v1623_v10, %v1621_v9  ;;  %v130_v15 = vld [vmem:[#allocation7 + $0x160] sm:$0xff]  ;;  %v127_v16 = vld [vmem:[#allocation7 + $0x148] sm:$0xff]  ;;  %v128_v17 = vld [vmem:[#allocation7 + $0x150] sm:$0xff]  ;;  %s1536_s4 = scalar_lea.vmem %s1198_s30, 256  ;;  %p1541_p2 = scmp.lt.s32.totalorder %s1198_s30, %s1198_s30 }
  0x2a   :  { %v1210_v22 = vld [vmem:[#allocation7 + $0x20] ss:$0 sm:$0xff]  ;;  %v143_v56 = vld [vmem:[#allocation7 + $0x248] sm:$0xff]  ;;  %v144_v62 = vld [vmem:[#allocation7 + $0x250] sm:$0xff]  ;;  %p1537_p1 = scmp.ne.s32.totalorder %s1198_s30, %s1536_s4  ;;  %p1542_p3 = scmp.lt.s32.totalorder %s1536_s4, %s1536_s4 }
  0x2c   :  { %1300 = vmatpush3.bf16.msra.mxu1 %v68_v8  ;;  %167 = vrot.lane.b32.xlu0 %v134_v11, %s1569_s0  ;;  %p1543_p4 = por %p1542_p3, %p1541_p2 }
  0x2d   :  { %163 = vrot.lane.b32.xlu1 %v132_v12, %s1569_s0  ;;  %1305 = vmatprep.subr.bf16.mxu1 %v1567_v0 }
  0x2e   :  { %p1544_p5 = pnand %p1543_p4, %p1537_p1 }
  0x2f   :  { %1302 = vmatmul.mubr.msk.bf16.vlgmr.msra.gmra.mxu1 %vm75_vm1, %v67_v13 }
  0x30   :  { %157 = vrot.lane.b32.xlu0 %v129_v14, %s1569_s0  ;;  %1313 = vmatprep.mubr.msk.bf16.mxu1 %vm1568_vm0, %v1567_v0 }
  0x31   :  { %159 = vrot.lane.b32.xlu1 %v130_v15, %s1569_s0 }
  0x34   :  { %153 = vrot.lane.b32.xlu0 %v127_v16, %s1569_s0 }
  0x35   :  { %155 = vrot.lane.b32.xlu1 %v128_v17, %s1569_s0 }
  0x9a   :  { %v166_v19 = vpop.permute.xlu0 %165 }
  0x9b   :  { %v162_v18 = vpop.permute.xlu1 %161 }
  0x9e   :  { %v168_v21 = vpop.permute.xlu0 %167 }
  0x9f   :  { %v164_v20 = vpop.permute.xlu1 %163 }
  0xa2   :  { %v158_v25 = vpop.permute.xlu0 %157 }
  0xa3   :  { %v160_v24 = vpop.permute.xlu1 %159 }
  0xa6   :  { %v154_v36 = vpop.permute.xlu0 %153 }
  0xa7   :  { %v156_v30 = vpop.permute.xlu1 %155 }
  0xef   :  { %v113_v23 = vpop.f32.mrf.mxu1 }
  0xf0   :  { %v1642_v27 = vadd.f32 %v1210_v22, %v113_v23 }
  0xf1   :  { %v1303_v26 = vpop.f32.mrf.mxu1 }
  0xf2   :  { %v183_v32 = vmul.f32 %v166_v19, %v1642_v27  ;;  %v181_v34 = vmul.f32 %v162_v18, %v1642_v27  ;;  %v177_v41 = vmul.f32 %v154_v36, %v1642_v27  ;;  %v179_v42 = vmul.f32 %v158_v25, %v1642_v27  ;;  %v142_v18 = vld [vmem:[#allocation7 + $0x200] sm:$0xff]  ;;  %v139_v26 = vld [vmem:[#allocation7 + $0x1e8] sm:$0xff] }
  0xf3   :  { %v116_v28 = vpop.f32.mrf.mxu1  ;;  %v120_v54 = vmul.f32 0.35355338, %v1642_v27 }
  0xf4   :  { %v1644_v29 = vadd.f32 %v1210_v22, %v116_v28  ;;  %v140_v28 = vld [vmem:[#allocation7 + $0x1f0] sm:$0xff] }
  0xf5   :  { %v1304_v31 = vpop.f32.mrf.mxu1 }
  0xf6   :  { %v184_v33 = vmul.f32 %v168_v21, %v1644_v29  ;;  %v182_v35 = vmul.f32 %v164_v20, %v1644_v29  ;;  %v178_v37 = vmul.f32 %v156_v30, %v1644_v29  ;;  %v180_v40 = vmul.f32 %v160_v24, %v1644_v29  ;;  %v137_v30 = vld [vmem:[#allocation7 + $0x1d8] sm:$0xff] }
  0xf7   :  { %v121_v53 = vmul.f32 0.35355338, %v1644_v29  ;;  %v306_v31 = vpack.c.bf16 %v140_v28, %v139_v26 }
  0xf8   :  { %v221_v38 = vpack.c.bf16 %v184_v33, %v183_v32  ;;  %v220_v39 = vpack.c.bf16 %v182_v35, %v181_v34  ;;  %v218_v43 = vpack.c.bf16 %v178_v37, %v177_v41  ;;  %v219_v44 = vpack.c.bf16 %v180_v40, %v179_v42  ;;  %v138_v32 = vld [vmem:[#allocation7 + $0x1e0] sm:$0xff]  ;;  %v124_v37 = vld [vmem:[#allocation7 + $0x38] sm:$0xff] }
  0xf9   :  { %v217_v55 = vpack.c.bf16 %v121_v53, %v120_v54  ;;  %v305_v35 = vpack.c.bf16 %v138_v32, %v137_v30 }
  0xfa   :  { %232 = vrot.lane.b32.xlu0 %v221_v38, %s1570_s2  ;;  %230 = vrot.lane.b32.xlu1 %v220_v39, %s1570_s2  ;;  %v125_v38 = vld [vmem:[#allocation7 + $0x40] sm:$0xff] }
  0xfb   :  { %v361_v39 = vpack.c.bf16 %v125_v38, %v124_v37  ;;  %v548_v37 = vld [vmem:[#allocation7 + $0x68] sm:$0xff]  ;;  %v545_v38 = vld [vmem:[#allocation7 + $0x50] sm:$0xff] }
  0xfe   :  { %228 = vrot.lane.b32.xlu0 %v219_v44, %s1570_s2  ;;  %226 = vrot.lane.b32.xlu1 %v218_v43, %s1570_s2 }
 0x102   :  { %185 = vrot.lane.b32.xlu0 %v127_v16, %s1571_s28  ;;  %187 = vrot.lane.b32.xlu1 %v128_v17, %s1571_s28  ;;  %v141_v17 = vld [vmem:[#allocation7 + $0x1f8] sm:$0xff] }
 0x103   :  { %v307_v19 = vpack.c.bf16 %v142_v18, %v141_v17 }
 0x105   :  { %1318 = vmatpush3.bf16.msra.mxu0 %v307_v19 }
 0x106   :  { %189 = vrot.lane.b32.xlu0 %v129_v14, %s1571_s28  ;;  %191 = vrot.lane.b32.xlu1 %v130_v15, %s1571_s28 }
 0x107   :  { %1319 = vmatprep.subr.bf16.mxu0 %v1567_v0 }
 0x109   :  { %1320 = vmatpush3.bf16.msra.mxu0 %v306_v31 }
 0x10a   :  { %193 = vrot.lane.b32.xlu0 %v1619_v7, %s1571_s28  ;;  %195 = vrot.lane.b32.xlu1 %v132_v12, %s1571_s28 }
 0x10b   :  { %1321 = vmatprep.subr.bf16.mxu0 %v1567_v0 }
 0x10d   :  { %1322 = vmatpush3.bf16.msra.mxu0 %v305_v35 }
 0x10e   :  { %197 = vrot.lane.b32.xlu0 %v1617_v6, %s1571_s28  ;;  %199 = vrot.lane.b32.xlu1 %v134_v11, %s1571_s28 }
 0x10f   :  { %1323 = vmatprep.subr.bf16.mxu0 %v1567_v0 }
 0x16c   :  { %v233_v45 = vpop.permute.xlu0 %232  ;;  %v231_v47 = vpop.permute.xlu1 %230 }
 0x16d   :  { %v247_v46 = vsel %vm75_vm1, %v233_v45, 0  ;;  %v244_v48 = vsel %vm75_vm1, %v231_v47, 0  ;;  %v123_v47 = vld [vmem:[#allocation7 + $0x30] sm:$0xff] }
 0x16e   :  { %1306 = vmatpush3.bf16.xpose.msra.mxu1 %v247_v46  ;;  %v122_v46 = vld [vmem:[#allocation7 + $0x28] sm:$0xff] }
 0x16f   :  { %1307 = vmatprep.subr.bf16.mxu1 %v1567_v0 }
 0x170   :  { %v229_v49 = vpop.permute.xlu0 %228  ;;  %v227_v51 = vpop.permute.xlu1 %226 }
 0x171   :  { %v241_v50 = vsel %vm75_vm1, %v229_v49, 0  ;;  %v238_v52 = vsel %vm75_vm1, %v227_v51, 0  ;;  %v360_v51 = vpack.c.bf16 %v123_v47, %v122_v46  ;;  %v1739_v46 = vld [vmem:[#allocation7 + $0x1b8] sm:$0xff]  ;;  %v1745_v47 = vld [vmem:[#allocation7 + $0x1b0] sm:$0xff] }
 0x174   :  { %v186_v58 = vpop.permute.xlu0 %185  ;;  %v188_v60 = vpop.permute.xlu1 %187 }
 0x175   :  { %v209_v13 = vmul.f32 %v186_v58, %v1642_v27  ;;  %v210_v14 = vmul.f32 %v188_v60, %v1644_v29 }
 0x176   :  { %1308 = vmatpush3.bf16.xpose.msra.mxu1 %v244_v48 }
 0x177   :  { %1309 = vmatprep.subr.bf16.mxu1 %v1567_v0  ;;  %v356_v23 = vpack.c.bf16 %v210_v14, %v209_v13 }
 0x178   :  { %v190_v5 = vpop.permute.xlu0 %189  ;;  %v192_v6 = vpop.permute.xlu1 %191 }
 0x179   :  { %v211_v11 = vmul.f32 %v190_v5, %v1642_v27  ;;  %v212_v12 = vmul.f32 %v192_v6, %v1644_v29 }
 0x17b   :  { %v357_v20 = vpack.c.bf16 %v212_v12, %v211_v11 }
 0x17c   :  { %v194_v7 = vpop.permute.xlu0 %193  ;;  %v196_v8 = vpop.permute.xlu1 %195 }
 0x17d   :  { %v213_v24 = vmul.f32 %v194_v7, %v1642_v27  ;;  %v214_v25 = vmul.f32 %v196_v8, %v1644_v29 }
 0x17e   :  { %1310 = vmatpush3.bf16.xpose.msra.mxu1 %v241_v50 }
 0x17f   :  { %1311 = vmatprep.subr.bf16.mxu1 %v1567_v0  ;;  %v358_v34 = vpack.c.bf16 %v214_v25, %v213_v24 }
 0x180   :  { %v198_v15 = vpop.permute.xlu0 %197  ;;  %v200_v16 = vpop.permute.xlu1 %199 }
 0x181   :  { %v215_v21 = vmul.f32 %v198_v15, %v1642_v27  ;;  %v216_v22 = vmul.f32 %v200_v16, %v1644_v29  ;;  %v135_v27 = vld [vmem:[#allocation7 + $0x1c8] sm:$0xff]  ;;  %v136_v29 = vld [vmem:[#allocation7 + $0x1d0] sm:$0xff] }
 0x182   :  { %v304_v36 = vpack.c.bf16 %v136_v29, %v135_v27  ;;  %v1218_v16 = vld [vmem:[#allocation7 + $0x48] ss:$0 sm:$0xff] }
 0x183   :  { %v359_v33 = vpack.c.bf16 %v216_v22, %v215_v21 }
 0x184   :  { %1324 = vmatpush3.bf16.msra.mxu0 %v304_v36  ;;  %v547_v36 = vld [vmem:[#allocation7 + $0x60] sm:$0xff] }
 0x185   :  { %1329 = vmatprep.subr.bf16.mxu0 %v361_v39 }
 0x186   :  { %1312 = vmatpush3.bf16.xpose.msra.mxu1 %v238_v52 }
 0x187   :  { %1353 = vmatprep.subr.bf16.mxu1 %v1567_v0 }
 0x18d   :  { %1314 = vmatmul.mubr.msk.bf16.vlgmr.msra.gmra.mxu1 %vm75_vm1, %v217_v55 }
 0x18e   :  { %1357 = vmatprep.mubr.msk.bf16.mxu1 %vm1568_vm0, %v1567_v0 }
 0x24d   :  { %v283_v57 = vpop.f32.mrf.mxu1 }
 0x24e   :  { %v284_v59 = vadd.f32 %v283_v57, %v143_v56 }
 0x24f   :  { %v1315_v61 = vpop.f32.mrf.mxu1 }
 0x250   :  { %v291_v63 = vsel %vm290_vm2, %v284_v59, -inf }
 0x251   :  { %292 = vmax.xlane.f32.xlu0 %v291_v63  ;;  %v286_v1 = vpop.f32.mrf.mxu1 }
 0x252   :  { %v287_v2 = vadd.f32 %v286_v1, %v144_v62 }
 0x253   :  { %v1316_v3 = vpop.f32.mrf.mxu1 }
 0x254   :  { %v294_v4 = vsel %vm290_vm2, %v287_v2, -inf }
 0x255   :  { %295 = vmax.xlane.f32.xlu1 %v294_v4 }
 0x266   :  { %368 = vrot.lane.b32.xlu1 %v357_v20, %s1571_s28 }
 0x267   :  { %366 = vrot.lane.b32.xlu0 %v356_v23, %s1571_s28 }
 0x26a   :  { %372 = vrot.lane.b32.xlu1 %v359_v33, %s1571_s28 }
 0x26b   :  { %370 = vrot.lane.b32.xlu0 %v358_v34, %s1571_s28 }
 0x2da   :  { %v293_v40 = vpop.xlane.xlu0 %292 }
 0x2db   :  { %v297_v41 = vsub.f32 %v284_v59, %v293_v40 }
 0x2dd   :  { %v299_v42 = vmul.f32 1.442695, %v297_v41  ;;  %v1721_v41 = vld [vmem:[#allocation7 + $0x188] sm:$0xff] }
 0x2de   :  { %v296_v43 = vpop.xlane.xlu1 %295  ;;  %v367_v52 = vpop.permute.xlu0 %366 }
 0x2df   :  { %v298_v44 = vsub.f32 %v287_v2, %v296_v43  ;;  %1448 = vpow2.f32 %v299_v42  ;;  %v1723_v42 = vld [vmem:[#allocation7 + $0x190] sm:$0xff]  ;;  %v1729_v43 = vld [vmem:[#allocation7 + $0x198] sm:$0xff] }
 0x2e1   :  { %v301_v45 = vmul.f32 1.442695, %v298_v44  ;;  %v1731_v44 = vld [vmem:[#allocation7 + $0x1a8] sm:$0xff] }
 0x2e2   :  { %v369_v53 = vpop.permute.xlu1 %368  ;;  %v371_v54 = vpop.permute.xlu0 %370 }
 0x2e3   :  { %1450 = vpow2.f32 %v301_v45  ;;  %v1737_v45 = vld [vmem:[#allocation7 + $0x1a0] sm:$0xff] }
 0x2e6   :  { %v373_v55 = vpop.permute.xlu1 %372 }
 0x2ec   :  { %v1449_v48 = vpop.eup %1448 }
 0x2f0   :  { %v1451_v49 = vpop.eup %1450 }
 0x2f1   :  { %v303_v50 = vpack.c.bf16 %v1451_v49, %v1449_v48 }
 0x2f3   :  { %1326 = vmatmul.mubr.msk.bf16.vlgmr.msra.gmra.mxu0 %vm290_vm2, %v303_v50 }
 0x2f4   :  { %1330 = vmatpush3.bf16.msra.mxu0 %v361_v39  ;;  %1333 = vmatprep.mubr.msk.bf16.mxu0 %vm75_vm1, %v367_v52  ;;  %v546_v39 = vld [vmem:[#allocation7 + $0x58] sm:$0xff] }
 0x2f5   :  { %1331 = vmatprep.subr.bf16.mxu0 %v360_v51  ;;  %v550_v40 = vpack.c.bf16 %v546_v39, %v545_v38 }
 0x2f8   :  { %1332 = vmatpush3.bf16.msra.mxu0 %v360_v51 }
 0x2f9   :  { %1341 = vmatprep.subr.bf16.mxu0 %v1567_v0 }
 0x2fb   :  { %1334 = vmatmul.mubr.msk.bf16.vlgmr.msra.gmra.mxu0 %vm75_vm1, %v369_v53 }
 0x2fc   :  { %1337 = vmatprep.mubr.msk.bf16.mxu0 %vm75_vm1, %v371_v54 }
 0x303   :  { %1338 = vmatmul.mubr.msk.bf16.gmra.mxu0 %vm75_vm1, %v373_v55 }
 0x304   :  { %1349 = vmatprep.mubr.msk.bf16.mxu0 %vm1568_vm0, %v1567_v0 }
 0x3b3   :  { %v345_v56 = vpop.f32.mrf.mxu0 }
 0x3b5   :  { %v1327_v57 = vpop.f32.mrf.mxu0 }
 0x3b6   :  { %v1750_v57 = vld [vmem:[#allocation7 + $0x138] ss:$0 sm:$0xff] }
 0x3b7   :  { %v348_v58 = vpop.f32.mrf.mxu0 }
 0x3b8   :  { %1452 = vrcp.f32 %v348_v58 }
 0x3b9   :  { %v1328_v59 = vpop.f32.mrf.mxu0  ;;  %1454 = vrcp.f32 %v345_v56 }
 0x3bb   :  { %v1335_v60 = vpop.f32.mrf.mxu0 }
 0x3bd   :  { %v420_v61 = vpop.f32.mrf.mxu0 }
 0x3bf   :  { %v1336_v62 = vpop.f32.mrf.mxu0 }
 0x3c0   :  { %v453_v8 = vpack.c.bf16 %v1336_v62, %v1335_v60 }
 0x3c1   :  { %v423_v63 = vpop.f32.mrf.mxu0 }
 0x3c2   :  { %v452_v13 = vpack.c.bf16 %v423_v63, %v420_v61  ;;  %v1753_v61 = vld [vmem:[#allocation7 + $0x140] ss:$0 sm:$0xff]  ;;  %v605_v63 = vld [vmem:[#allocation7 + $0x88] sm:$0xff] }
 0x3c3   :  { %v1339_v1 = vpop.f32.mrf.mxu0 }
 0x3c5   :  { %v436_v2 = vpop.f32.mrf.mxu0  ;;  %v1453_v7 = vpop.eup %1452 }
 0x3c6   :  { %v1455_v11 = vpop.eup %1454  ;;  %v355_v12 = vmul.f32 %v1453_v7, %v1451_v49  ;;  %v604_v7 = vld [vmem:[#allocation7 + $0x80] sm:$0xff] }
 0x3c7   :  { %v1340_v3 = vpop.f32.mrf.mxu0  ;;  %v354_v14 = vmul.f32 %v1455_v11, %v1449_v48  ;;  %v671_v48 = vld [vmem:[#allocation7 + $0x1c0] sm:$0xff]  ;;  %v59_v11 = vld [vmem:[#allocation5] sm:$0xff] }
 0x3c8   :  { %v455_v4 = vpack.c.bf16 %v1340_v3, %v1339_v1  ;;  %v606_v1 = vld [vmem:[#allocation7 + $0x90] sm:$0xff] }
 0x3c9   :  { %v439_v5 = vpop.f32.mrf.mxu0  ;;  %v451_v15 = vpack.c.bf16 %v355_v12, %v354_v14  ;;  %v60_v12 = vld [vmem:[#allocation5 + $0x8] sm:$0xff] }
 0x3ca   :  { %1342 = vmatpush3.bf16.msra.mxu0 %v455_v4  ;;  %v454_v6 = vpack.c.bf16 %v439_v5, %v436_v2  ;;  %v609_v4 = vpack.c.bf16 %v606_v1, %v605_v63  ;;  %v1222_v1 = vld [vmem:[#allocation7 + $0x70] ss:$0 sm:$0xff] }
 0x3cb   :  { %1343 = vmatprep.subr.bf16.mxu0 %v1567_v0 }
 0x3ce   :  { %1344 = vmatpush3.bf16.msra.mxu0 %v454_v6  ;;  %v603_v6 = vld [vmem:[#allocation7 + $0x78] sm:$0xff] }
 0x3cf   :  { %1345 = vmatprep.subr.bf16.mxu0 %v1567_v0 }
 0x3d2   :  { %1346 = vmatpush3.bf16.msra.mxu0 %v453_v8  ;;  %v608_v8 = vpack.c.bf16 %v604_v7, %v603_v6 }
 0x3d3   :  { %1347 = vmatprep.subr.bf16.mxu0 %v1567_v0 }
 0x3d6   :  { %1348 = vmatpush3.bf16.msra.mxu0 %v452_v13  ;;  %v607_v13 = vpack.c.bf16 %v60_v12, %v59_v11  ;;  %v681_v12 = vld [vmem:[#allocation7 + $0x260] sm:$0xff] }
 0x3d7   :  { %1369 = vmatprep.subr.bf16.mxu0 %v1567_v0 }
 0x3d9   :  { %1350 = vmatmul.mubr.msk.bf16.vlgmr.msra.gmra.mxu0 %vm290_vm2, %v451_v15 }
 0x3da   :  { %1377 = vmatprep.mubr.msk.bf16.mxu0 %vm1568_vm0, %v1567_v0 }
 0x499   :  { %v497_v17 = vpop.f32.mrf.mxu0 }
 0x49a   :  { %v498_v18 = vadd.f32 %v1218_v16, %v497_v17 }
 0x49b   :  { %v1351_v19 = vpop.f32.mrf.mxu0 }
 0x49c   :  { %v504_v20 = vadd.f32 %v498_v18, %v1621_v9 }
 0x49d   :  { %v500_v21 = vpop.f32.mrf.mxu0 }
 0x49e   :  { %v501_v22 = vadd.f32 %v1218_v16, %v500_v21  ;;  %v506_v23 = vsel %vm75_vm1, %v504_v20, 0.0 }
 0x49f   :  { %507 = vadd.xlane.f32.xlu0 %v506_v23  ;;  %v1352_v24 = vpop.f32.mrf.mxu0 }
 0x4a0   :  { %v505_v25 = vadd.f32 %v501_v22, %v1623_v10  ;;  %v551_v10 = vpack.c.bf16 %v548_v37, %v547_v36  ;;  %v1224_v24 = vld [vmem:[#allocation7 + $0x98] ss:$0 sm:$0xff] }
 0x4a2   :  { %v509_v26 = vsel %vm75_vm1, %v505_v25, 0.0  ;;  %1354 = vmatpush3.bf16.msra.mxu1 %v551_v10 }
 0x4a3   :  { %510 = vadd.xlane.f32.xlu1 %v509_v26  ;;  %1355 = vmatprep.subr.bf16.mxu1 %v1567_v0 }
 0x4a6   :  { %1356 = vmatpush3.bf16.msra.mxu1 %v550_v40 }
 0x4a7   :  { %1361 = vmatprep.subr.bf16.mxu1 %v1567_v0 }
 0x4b4   :  { %698 = vrot.lane.b32.xlu1 %v1721_v41, %s1569_s0 }
 0x4b8   :  { %702 = vrot.lane.b32.xlu1 %v1729_v43, %s1569_s0 }
 0x4bc   :  { %704 = vrot.lane.b32.xlu1 %v1737_v45, %s1569_s0 }
 0x4c0   :  { %708 = vrot.lane.b32.xlu1 %v1745_v47, %s1569_s0 }
 0x4c4   :  { %712 = vrot.lane.b32.xlu1 %v671_v48, %s1569_s0 }
 0x528   :  { %v508_v28 = vpop.xlane.xlu0 %507 }
 0x529   :  { %v513_v30 = vmul.f32 0.03125, %v508_v28 }
 0x52b   :  { %v515_v31 = vsub.f32 %v504_v20, %v513_v30 }
 0x52c   :  { %v511_v32 = vpop.xlane.xlu1 %510 }
 0x52d   :  { %v514_v33 = vmul.f32 0.03125, %v511_v32  ;;  %v517_v34 = vmul.f32 %v515_v31, %v515_v31 }
 0x52f   :  { %v516_v35 = vsub.f32 %v505_v25, %v514_v33  ;;  %v519_v9 = vsel %vm75_vm1, %v517_v34, 0.0 }
 0x530   :  { %520 = vadd.xlane.f32.xlu0 %v519_v9  ;;  %v699_v14 = vpop.permute.xlu1 %698 }
 0x531   :  { %v518_v27 = vmul.f32 %v516_v35, %v516_v35 }
 0x533   :  { %v522_v29 = vsel %vm75_vm1, %v518_v27, 0.0 }
 0x534   :  { %523 = vadd.xlane.f32.xlu0 %v522_v29  ;;  %v703_v15 = vpop.permute.xlu1 %702 }
 0x538   :  { %v705_v18 = vpop.permute.xlu1 %704 }
 0x53c   :  { %v709_v23 = vpop.permute.xlu1 %708 }
 0x540   :  { %v713_v32 = vpop.permute.xlu1 %712 }
 0x54a   :  { %700 = vrot.lane.b32.xlu0 %v1723_v42, %s1569_s0 }
 0x54e   :  { %706 = vrot.lane.b32.xlu0 %v1731_v44, %s1569_s0 }
 0x552   :  { %710 = vrot.lane.b32.xlu0 %v1739_v46, %s1569_s0 }
 0x5b9   :  { %v521_v49 = vpop.xlane.xlu0 %520 }
 0x5ba   :  { %v525_v50 = vmul.f32 0.03125, %v521_v49 }
 0x5bc   :  { %v527_v51 = vadd.f32 1e-05, %v525_v50 }
 0x5bd   :  { %v524_v52 = vpop.xlane.xlu0 %523 }
 0x5be   :  { %1456 = vrsqrt.f32 %v527_v51  ;;  %v526_v53 = vmul.f32 0.03125, %v524_v52 }
 0x5c0   :  { %v528_v54 = vadd.f32 1e-05, %v526_v53 }
 0x5c1   :  { %v701_v16 = vpop.permute.xlu0 %700 }
 0x5c2   :  { %1458 = vrsqrt.f32 %v528_v54 }
 0x5c5   :  { %v707_v21 = vpop.permute.xlu0 %706 }
 0x5c9   :  { %v711_v30 = vpop.permute.xlu0 %710 }
 0x5cb   :  { %v1457_v55 = vpop.eup %1456 }
 0x5cc   :  { %v531_v56 = vmul.f32 %v1457_v55, %v515_v31 }
 0x5ce   :  { %v537_v60 = vmul.f32 %v1750_v57, %v531_v56 }
 0x5cf   :  { %v1459_v58 = vpop.eup %1458 }
 0x5d0   :  { %v532_v59 = vmul.f32 %v1459_v58, %v516_v35  ;;  %v1757_v2 = vadd.f32 %v1753_v61, %v537_v60 }
 0x5d2   :  { %v538_v62 = vmul.f32 %v1750_v57, %v532_v59 }
 0x5d4   :  { %v1760_v3 = vadd.f32 %v1753_v61, %v538_v62 }
 0x5d6   :  { %v549_v5 = vpack.c.bf16 %v1760_v3, %v1757_v2 }
 0x5d8   :  { %1358 = vmatmul.mubr.msk.bf16.vlgmr.msra.gmra.mxu1 %vm75_vm1, %v549_v5 }
 0x5d9   :  { %1362 = vmatpush3.bf16.msra.mxu1 %v609_v4  ;;  %1365 = vmatprep.mubr.msk.bf16.mxu1 %vm1568_vm0, %v1567_v0 }
 0x5da   :  { %1363 = vmatprep.subr.bf16.mxu1 %v1567_v0 }
 0x5dd   :  { %1364 = vmatpush3.bf16.msra.mxu1 %v608_v8 }
 0x5de   :  { %1381 = vmatprep.subr.bf16.mxu1 %v1567_v0 }
 0x5e0   :  { %1366 = vmatmul.mubr.msk.bf16.vlgmr.msra.gmra.mxu1 %vm75_vm1, %v607_v13 }
 0x5e1   :  { %1389 = vmatprep.mubr.msk.bf16.mxu1 %vm1568_vm0, %v1567_v0 }
 0x698   :  { %v594_v17 = vpop.f32.mrf.mxu1 }
 0x699   :  { %v595_v5 = vadd.f32 %v1222_v1, %v594_v17 }
 0x69a   :  { %v1359_v19 = vpop.f32.mrf.mxu1 }
 0x69b   :  { %v679_v19 = vld [vmem:[#allocation7 + $0x240] sm:$0xff] }
 0x69c   :  { %v597_v20 = vpop.f32.mrf.mxu1 }
 0x69d   :  { %v598_v4 = vadd.f32 %v1222_v1, %v597_v20 }
 0x69e   :  { %v1360_v22 = vpop.f32.mrf.mxu1 }
 0x69f   :  { %v602_v6 = vmul.f32 0.35355338, %v598_v4  ;;  %v677_v22 = vld [vmem:[#allocation7 + $0x230] sm:$0xff] }
 0x6a0   :  { %v652_v25 = vpop.f32.mrf.mxu1 }
 0x6a1   :  { %v653_v26 = vadd.f32 %v1224_v24, %v652_v25  ;;  %v675_v25 = vld [vmem:[#allocation7 + $0x220] sm:$0xff] }
 0x6a2   :  { %v1367_v28 = vpop.f32.mrf.mxu1 }
 0x6a3   :  { %v1772_v34 = vmul.f32 %v711_v30, %v653_v26  ;;  %v688_v9 = vmul.f32 %v1739_v46, %v653_v26  ;;  %v724_v36 = vmul.f32 %v703_v15, %v653_v26  ;;  %v722_v37 = vmul.f32 %v699_v14, %v653_v26  ;;  %v672_v28 = vld [vmem:[#allocation7 + $0x208] sm:$0xff]  ;;  %v673_v30 = vld [vmem:[#allocation7 + $0x210] sm:$0xff] }
 0x6a4   :  { %v655_v31 = vpop.f32.mrf.mxu1  ;;  %v1777_v39 = vmul.f32 %v707_v21, %v653_v26  ;;  %v686_v54 = vmul.f32 %v1731_v44, %v653_v26  ;;  %v684_v59 = vmul.f32 %v1729_v43, %v653_v26  ;;  %v682_v44 = vmul.f32 %v1721_v41, %v653_v26  ;;  %v676_v21 = vld [vmem:[#allocation7 + $0x228] sm:$0xff] }
 0x6a5   :  { %v656_v33 = vadd.f32 %v1224_v24, %v655_v31  ;;  %v601_v43 = vmul.f32 0.35355338, %v595_v5  ;;  %v806_v24 = vpack.c.bf16 %v677_v22, %v676_v21  ;;  %v804_v31 = vpack.c.bf16 %v673_v30, %v672_v28 }
 0x6a6   :  { %v1368_v35 = vpop.f32.mrf.mxu1 }
 0x6a7   :  { %v1775_v27 = vmul.f32 %v713_v32, %v656_v33  ;;  %v689_v29 = vmul.f32 %v671_v48, %v656_v33  ;;  %v725_v10 = vmul.f32 %v705_v18, %v656_v33  ;;  %v723_v38 = vmul.f32 %v701_v16, %v656_v33  ;;  %v678_v18 = vld [vmem:[#allocation7 + $0x238] sm:$0xff]  ;;  %v661_v32 = vld [vmem:[#allocation7 + $0xb0] sm:$0xff] }
 0x6a8   :  { %v1779_v40 = vmul.f32 %v709_v23, %v656_v33  ;;  %v687_v48 = vmul.f32 %v1745_v47, %v656_v33  ;;  %v685_v58 = vmul.f32 %v1737_v45, %v656_v33  ;;  %v683_v47 = vmul.f32 %v1723_v42, %v656_v33  ;;  %v680_v42 = vld [vmem:[#allocation7 + $0x258] sm:$0xff] }
 0x6a9   :  { %v859_v49 = vpack.c.bf16 %v1775_v27, %v1772_v34  ;;  %v734_v50 = vpack.c.bf16 %v689_v29, %v688_v9  ;;  %v857_v51 = vpack.c.bf16 %v725_v10, %v724_v36  ;;  %v856_v52 = vpack.c.bf16 %v723_v38, %v722_v37  ;;  %v674_v23 = vld [vmem:[#allocation7 + $0x218] sm:$0xff]  ;;  %v659_v10 = vld [vmem:[#allocation7 + $0xa0] sm:$0xff]  ;;  %v660_v38 = vld [vmem:[#allocation7 + $0xa8] sm:$0xff] }
 0x6aa   :  { %v858_v46 = vpack.c.bf16 %v1779_v40, %v1777_v39  ;;  %v733_v55 = vpack.c.bf16 %v687_v48, %v686_v54  ;;  %v732_v60 = vpack.c.bf16 %v685_v58, %v684_v59  ;;  %v731_v63 = vpack.c.bf16 %v683_v47, %v682_v44  ;;  %v662_v33 = vld [vmem:[#allocation7 + $0xb8] sm:$0xff] }
 0x6ab   :  { %v748_v53 = vsel %vm75_vm1, %v734_v50, 0  ;;  %v730_v7 = vpack.c.bf16 %v602_v6, %v601_v43  ;;  %v807_v20 = vpack.c.bf16 %v679_v19, %v678_v18  ;;  %v805_v26 = vpack.c.bf16 %v675_v25, %v674_v23 }
 0x6ac   :  { %1370 = vmatpush3.bf16.xpose.msra.mxu0 %v748_v53  ;;  %v745_v56 = vsel %vm75_vm1, %v733_v55, 0  ;;  %v742_v62 = vsel %vm75_vm1, %v732_v60, 0  ;;  %v739_v45 = vsel %vm75_vm1, %v731_v63, 0  ;;  %v861_v34 = vpack.c.bf16 %v662_v33, %v661_v32  ;;  %v1038_v33 = vld [vmem:[#allocation7 + $0xd8] sm:$0xff] }
 0x6ad   :  { %1371 = vmatprep.subr.bf16.mxu0 %v1567_v0  ;;  %1382 = vmatpush3.bf16.msra.mxu1 %v807_v20  ;;  %v860_v50 = vpack.c.bf16 %v660_v38, %v659_v10 }
 0x6ae   :  { %1383 = vmatprep.subr.bf16.mxu1 %v1567_v0 }
 0x6b1   :  { %1384 = vmatpush3.bf16.msra.mxu1 %v806_v24 }
 0x6b2   :  { %1385 = vmatprep.subr.bf16.mxu1 %v1567_v0 }
 0x6b4   :  { %1372 = vmatpush3.bf16.xpose.msra.mxu0 %v745_v56 }
 0x6b5   :  { %1373 = vmatprep.subr.bf16.mxu0 %v1567_v0  ;;  %1386 = vmatpush3.bf16.msra.mxu1 %v805_v26 }
 0x6b6   :  { %1387 = vmatprep.subr.bf16.mxu1 %v1567_v0 }
 0x6b9   :  { %1388 = vmatpush3.bf16.msra.mxu1 %v804_v31 }
 0x6ba   :  { %1393 = vmatprep.subr.bf16.mxu1 %v861_v34 }
 0x6bc   :  { %1374 = vmatpush3.bf16.xpose.msra.mxu0 %v742_v62 }
 0x6bd   :  { %1375 = vmatprep.subr.bf16.mxu0 %v1567_v0 }
 0x6c4   :  { %1376 = vmatpush3.bf16.xpose.msra.mxu0 %v739_v45 }
 0x6c5   :  { %1417 = vmatprep.subr.bf16.mxu0 %v1567_v0 }
 0x6cb   :  { %1378 = vmatmul.mubr.msk.bf16.vlgmr.msra.gmra.mxu0 %vm75_vm1, %v730_v7 }
 0x6cc   :  { %1421 = vmatprep.mubr.msk.bf16.mxu0 %vm1568_vm0, %v1567_v0 }
 0x78b   :  { %v784_v8 = vpop.f32.mrf.mxu0 }
 0x78c   :  { %v785_v41 = vadd.f32 %v784_v8, %v680_v42 }
 0x78d   :  { %v1379_v11 = vpop.f32.mrf.mxu0 }
 0x78e   :  { %v791_v13 = vsel %vm290_vm2, %v785_v41, -inf  ;;  %v1232_v11 = vld [vmem:[#allocation7 + $0xc0] ss:$0 sm:$0xff] }
 0x78f   :  { %792 = vmax.xlane.f32.xlu0 %v791_v13  ;;  %v787_v14 = vpop.f32.mrf.mxu0 }
 0x790   :  { %v788_v15 = vadd.f32 %v787_v14, %v681_v12 }
 0x791   :  { %v1380_v16 = vpop.f32.mrf.mxu0 }
 0x792   :  { %v794_v17 = vsel %vm290_vm2, %v788_v15, -inf }
 0x793   :  { %795 = vmax.xlane.f32.xlu1 %v794_v17 }
 0x7a4   :  { %868 = vrot.lane.b32.xlu1 %v857_v51, %s1570_s2 }
 0x7a5   :  { %866 = vrot.lane.b32.xlu0 %v856_v52, %s1570_s2 }
 0x7a8   :  { %872 = vrot.lane.b32.xlu1 %v859_v49, %s1570_s2 }
 0x7a9   :  { %870 = vrot.lane.b32.xlu0 %v858_v46, %s1570_s2 }
 0x818   :  { %v793_v35 = vpop.xlane.xlu0 %792 }
 0x819   :  { %v797_v9 = vsub.f32 %v785_v41, %v793_v35  ;;  %v1036_v35 = vld [vmem:[#allocation7 + $0xc8] sm:$0xff] }
 0x81b   :  { %v799_v27 = vmul.f32 1.442695, %v797_v9  ;;  %v1037_v9 = vld [vmem:[#allocation7 + $0xd0] sm:$0xff] }
 0x81c   :  { %v796_v29 = vpop.xlane.xlu1 %795  ;;  %v867_v51 = vpop.permute.xlu0 %866 }
 0x81d   :  { %v798_v36 = vsub.f32 %v788_v15, %v796_v29  ;;  %1460 = vpow2.f32 %v799_v27  ;;  %v1041_v27 = vpack.c.bf16 %v1037_v9, %v1036_v35 }
 0x81f   :  { %v801_v37 = vmul.f32 1.442695, %v798_v36 }
 0x820   :  { %v869_v52 = vpop.permute.xlu1 %868  ;;  %v871_v46 = vpop.permute.xlu0 %870 }
 0x821   :  { %1462 = vpow2.f32 %v801_v37 }
 0x824   :  { %v873_v53 = vpop.permute.xlu1 %872 }
 0x82a   :  { %v1461_v39 = vpop.eup %1460 }
 0x82e   :  { %v1463_v40 = vpop.eup %1462 }
 0x82f   :  { %v803_v49 = vpack.c.bf16 %v1463_v40, %v1461_v39 }
 0x831   :  { %1390 = vmatmul.mubr.msk.bf16.vlgmr.msra.gmra.mxu1 %vm290_vm2, %v803_v49 }
 0x832   :  { %1394 = vmatpush3.bf16.msra.mxu1 %v861_v34  ;;  %1397 = vmatprep.mubr.msk.bf16.mxu1 %vm75_vm1, %v867_v51  ;;  %v1039_v34 = vld [vmem:[#allocation7 + $0xe0] sm:$0xff] }
 0x833   :  { %1395 = vmatprep.subr.bf16.mxu1 %v860_v50 }
 0x836   :  { %1396 = vmatpush3.bf16.msra.mxu1 %v860_v50 }
 0x837   :  { %1405 = vmatprep.subr.bf16.mxu1 %v1567_v0 }
 0x839   :  { %1398 = vmatmul.mubr.msk.bf16.vlgmr.msra.gmra.mxu1 %vm75_vm1, %v869_v52 }
 0x83a   :  { %1401 = vmatprep.mubr.msk.bf16.mxu1 %vm75_vm1, %v871_v46 }
 0x841   :  { %1402 = vmatmul.mubr.msk.bf16.gmra.mxu1 %vm75_vm1, %v873_v53  ;;  %v1100_v53 = vld [vmem:[#allocation7 + $0x120] sm:$0xff] }
 0x842   :  { %1413 = vmatprep.mubr.msk.bf16.mxu1 %vm1568_vm0, %v1567_v0 }
 0x8f1   :  { %v845_v48 = vpop.f32.mrf.mxu1 }
 0x8f3   :  { %v1391_v54 = vpop.f32.mrf.mxu1 }
 0x8f5   :  { %v848_v55 = vpop.f32.mrf.mxu1 }
 0x8f6   :  { %1464 = vrcp.f32 %v848_v55 }
 0x8f7   :  { %v1392_v56 = vpop.f32.mrf.mxu1  ;;  %1466 = vrcp.f32 %v845_v48  ;;  %v1101_v48 = vld [vmem:[#allocation7 + $0x128] sm:$0xff] }
 0x8f8   :  { %v1106_v56 = vpack.c.bf16 %v1101_v48, %v1100_v53 }
 0x8f9   :  { %v1399_v58 = vpop.f32.mrf.mxu1 }
 0x8fb   :  { %v920_v59 = vpop.f32.mrf.mxu1 }
 0x8fd   :  { %v1400_v60 = vpop.f32.mrf.mxu1 }
 0x8fe   :  { %v953_v6 = vpack.c.bf16 %v1400_v60, %v1399_v58  ;;  %v1099_v60 = vld [vmem:[#allocation7 + $0x118] sm:$0xff] }
 0x8ff   :  { %v923_v62 = vpop.f32.mrf.mxu1 }
 0x900   :  { %v952_v42 = vpack.c.bf16 %v923_v62, %v920_v59  ;;  %v1098_v59 = vld [vmem:[#allocation7 + $0x110] sm:$0xff] }
 0x901   :  { %v1403_v47 = vpop.f32.mrf.mxu1  ;;  %v1105_v62 = vpack.c.bf16 %v1099_v60, %v1098_v59 }
 0x903   :  { %v936_v44 = vpop.f32.mrf.mxu1  ;;  %v1465_v45 = vpop.eup %1464 }
 0x904   :  { %v1467_v43 = vpop.eup %1466  ;;  %v855_v7 = vmul.f32 %v1465_v45, %v1463_v40  ;;  %v1234_v45 = vld [vmem:[#allocation7 + $0xe8] ss:$0 sm:$0xff] }
 0x905   :  { %v1404_v63 = vpop.f32.mrf.mxu1  ;;  %v854_v8 = vmul.f32 %v1467_v43, %v1461_v39 }
 0x906   :  { %v955_v1 = vpack.c.bf16 %v1404_v63, %v1403_v47  ;;  %v1096_v47 = vld [vmem:[#allocation7 + $0x100] sm:$0xff] }
 0x907   :  { %v939_v4 = vpop.f32.mrf.mxu1  ;;  %v951_v41 = vpack.c.bf16 %v855_v7, %v854_v8 }
 0x908   :  { %1406 = vmatpush3.bf16.msra.mxu1 %v955_v1  ;;  %v954_v5 = vpack.c.bf16 %v939_v4, %v936_v44  ;;  %v1097_v44 = vld [vmem:[#allocation7 + $0x108] sm:$0xff]  ;;  %v1094_v1 = vld [vmem:[#allocation7 + $0xf0] sm:$0xff]  ;;  %v1095_v4 = vld [vmem:[#allocation7 + $0xf8] sm:$0xff] }
 0x909   :  { %1407 = vmatprep.subr.bf16.mxu1 %v1567_v0  ;;  %v1104_v63 = vpack.c.bf16 %v1097_v44, %v1096_v47 }
 0x90c   :  { %1408 = vmatpush3.bf16.msra.mxu1 %v954_v5  ;;  %v1103_v5 = vpack.c.bf16 %v1095_v4, %v1094_v1 }
 0x90d   :  { %1409 = vmatprep.subr.bf16.mxu1 %v1567_v0 }
 0x910   :  { %1410 = vmatpush3.bf16.msra.mxu1 %v953_v6 }
 0x911   :  { %1411 = vmatprep.subr.bf16.mxu1 %v1567_v0 }
 0x914   :  { %1412 = vmatpush3.bf16.msra.mxu1 %v952_v42 }
 0x917   :  { %1414 = vmatmul.mubr.msk.bf16.vlgmr.msra.gmra.mxu1 %vm290_vm2, %v951_v41 }
 0x9d7   :  { %v997_v12 = vpop.f32.mrf.mxu1 }
 0x9d8   :  { %v998_v13 = vadd.f32 %v1232_v11, %v997_v12 }
 0x9d9   :  { %v1415_v14 = vpop.f32.mrf.mxu1 }
 0x9da   :  { %v1004_v15 = vadd.f32 %v998_v13, %v1757_v2  ;;  %v1236_v14 = vld [vmem:[#allocation7 + $0x130] ss:$0 sm:$0xff] }
 0x9db   :  { %v1000_v16 = vpop.f32.mrf.mxu1 }
 0x9dc   :  { %v1001_v17 = vadd.f32 %v1232_v11, %v1000_v16  ;;  %v1006_v18 = vsel %vm75_vm1, %v1004_v15, 0.0 }
 0x9dd   :  { %1007 = vadd.xlane.f32.xlu0 %v1006_v18  ;;  %v1416_v19 = vpop.f32.mrf.mxu1 }
 0x9de   :  { %v1005_v20 = vadd.f32 %v1001_v17, %v1760_v3  ;;  %v1042_v3 = vpack.c.bf16 %v1039_v34, %v1038_v33 }
 0x9e0   :  { %v1009_v21 = vsel %vm75_vm1, %v1005_v20, 0.0  ;;  %1418 = vmatpush3.bf16.msra.mxu0 %v1042_v3 }
 0x9e1   :  { %1010 = vadd.xlane.f32.xlu1 %v1009_v21  ;;  %1419 = vmatprep.subr.bf16.mxu0 %v1567_v0 }
 0x9e4   :  { %1420 = vmatpush3.bf16.msra.mxu0 %v1041_v27 }
 0x9e5   :  { %1425 = vmatprep.subr.bf16.mxu0 %v1567_v0 }
 0xa66   :  { %v1008_v22 = vpop.xlane.xlu0 %1007 }
 0xa67   :  { %v1012_v23 = vmul.f32 0.03125, %v1008_v22 }
 0xa69   :  { %v1014_v24 = vsub.f32 %v1004_v15, %v1012_v23 }
 0xa6a   :  { %v1011_v25 = vpop.xlane.xlu1 %1010 }
 0xa6b   :  { %v1013_v26 = vmul.f32 0.03125, %v1011_v25  ;;  %v1016_v28 = vmul.f32 %v1014_v24, %v1014_v24 }
 0xa6d   :  { %v1015_v30 = vsub.f32 %v1005_v20, %v1013_v26  ;;  %v1018_v2 = vsel %vm75_vm1, %v1016_v28, 0.0 }
 0xa6e   :  { %1019 = vadd.xlane.f32.xlu0 %v1018_v2 }
 0xa6f   :  { %v1017_v31 = vmul.f32 %v1015_v30, %v1015_v30 }
 0xa71   :  { %v1021_v32 = vsel %vm75_vm1, %v1017_v31, 0.0 }
 0xa72   :  { %1022 = vadd.xlane.f32.xlu0 %v1021_v32 }
 0xaf7   :  { %v1020_v29 = vpop.xlane.xlu0 %1019 }
 0xaf8   :  { %v1024_v36 = vmul.f32 0.03125, %v1020_v29 }
 0xafa   :  { %v1026_v37 = vadd.f32 1e-05, %v1024_v36 }
 0xafb   :  { %v1023_v10 = vpop.xlane.xlu0 %1022 }
 0xafc   :  { %1468 = vrsqrt.f32 %v1026_v37  ;;  %v1025_v38 = vmul.f32 0.03125, %v1023_v10 }
 0xafe   :  { %v1027_v39 = vadd.f32 1e-05, %v1025_v38 }
 0xb00   :  { %1470 = vrsqrt.f32 %v1027_v39 }
 0xb09   :  { %v1469_v40 = vpop.eup %1468 }
 0xb0a   :  { %v1030_v49 = vmul.f32 %v1469_v40, %v1014_v24 }
 0xb0c   :  { %v1032_v52 = vmul.f32 %v1750_v57, %v1030_v49 }
 0xb0d   :  { %v1471_v50 = vpop.eup %1470 }
 0xb0e   :  { %v1031_v51 = vmul.f32 %v1471_v50, %v1015_v30  ;;  %v1034_v54 = vadd.f32 %v1753_v61, %v1032_v52 }
 0xb10   :  { %v1033_v46 = vmul.f32 %v1750_v57, %v1031_v51 }
 0xb12   :  { %v1035_v55 = vadd.f32 %v1753_v61, %v1033_v46 }
 0xb14   :  { %v1040_v58 = vpack.c.bf16 %v1035_v55, %v1034_v54 }
 0xb16   :  { %1422 = vmatmul.mubr.msk.bf16.vlgmr.msra.gmra.mxu0 %vm75_vm1, %v1040_v58 }
 0xb17   :  { %1426 = vmatpush3.bf16.msra.mxu0 %v1106_v56  ;;  %1433 = vmatprep.mubr.msk.bf16.mxu0 %vm1568_vm0, %v1567_v0 }
 0xb18   :  { %1427 = vmatprep.subr.bf16.mxu0 %v1567_v0 }
 0xb1b   :  { %1428 = vmatpush3.bf16.msra.mxu0 %v1105_v62 }
 0xb1c   :  { %1429 = vmatprep.subr.bf16.mxu0 %v1567_v0 }
 0xb1f   :  { %1430 = vmatpush3.bf16.msra.mxu0 %v1104_v63 }
 0xb20   :  { %1431 = vmatprep.subr.bf16.mxu0 %v1567_v0 }
 0xb23   :  { %1432 = vmatpush3.bf16.msra.mxu0 %v1103_v5 }
 0xbd6   :  { %v1085_v6 = vpop.f32.mrf.mxu0 }
 0xbd7   :  { %v1086_v7 = vadd.f32 %v1234_v45, %v1085_v6 }
 0xbd8   :  { %v1423_v43 = vpop.f32.mrf.mxu0 }
 0xbd9   :  { %v1092_v11 = vmax.f32 %v1086_v7, 0.0 }
 0xbda   :  { %v1088_v42 = vpop.f32.mrf.mxu0 }
 0xbdb   :  { %v1089_v8 = vadd.f32 %v1234_v45, %v1088_v42 }
 0xbdc   :  { %v1424_v41 = vpop.f32.mrf.mxu0 }
 0xbdd   :  { %v1093_v12 = vmax.f32 %v1089_v8, 0.0 }
 0xbdf   :  { %v1102_v13 = vpack.c.bf16 %v1093_v12, %v1092_v11 }
 0xbe1   :  { %1434 = vmatmul.mubr.msk.bf16.vlgmr.msra.gmra.mxu0 %vm290_vm2, %v1102_v13 }
 0xca1   :  { %v1149_v15 = vpop.f32.mrf.mxu0 }
 0xca2   :  { %v1150_v16 = vadd.f32 %v1236_v14, %v1149_v15 }
 0xca3   :  { %v1435_v0 = vpop.f32.mrf.mxu0 }
 0xca4   :  { %v1156_v17 = vadd.f32 %v1150_v16, %v1034_v54 }
 0xca5   :  { %v1152_v18 = vpop.f32.mrf.mxu0 }
 0xca6   :  { %v1153_v19 = vadd.f32 %v1236_v14, %v1152_v18  ;;  %v1158_v20 = vsel %vm75_vm1, %v1156_v17, 0.0 }
 0xca7   :  { %1159 = vadd.xlane.f32.xlu1 %v1158_v20  ;;  %v1436_v21 = vpop.f32.mrf.mxu0 }
 0xca8   :  { %v1157_v22 = vadd.f32 %v1153_v19, %v1035_v55 }
 0xcaa   :  { %v1161_v23 = vsel %vm75_vm1, %v1157_v22, 0.0 }
 0xcab   :  { %1162 = vadd.xlane.f32.xlu0 %v1161_v23 }
 0xd30   :  { %v1160_v24 = vpop.xlane.xlu1 %1159 }
 0xd31   :  { %v1164_v25 = vmul.f32 0.03125, %v1160_v24 }
 0xd33   :  { %v1166_v26 = vsub.f32 %v1156_v17, %v1164_v25 }
 0xd34   :  { %v1163_v28 = vpop.xlane.xlu0 %1162 }
 0xd35   :  { %v1165_v30 = vmul.f32 0.03125, %v1163_v28  ;;  %v1168_v2 = vmul.f32 %v1166_v26, %v1166_v26 }
 0xd37   :  { %v1167_v31 = vsub.f32 %v1157_v22, %v1165_v30  ;;  %v1170_v32 = vsel %vm75_vm1, %v1168_v2, 0.0 }
 0xd38   :  { %1171 = vadd.xlane.f32.xlu1 %v1170_v32 }
 0xd39   :  { %v1169_v33 = vmul.f32 %v1167_v31, %v1167_v31 }
 0xd3b   :  { %v1173_v34 = vsel %vm75_vm1, %v1169_v33, 0.0 }
 0xd3c   :  { %1174 = vadd.xlane.f32.xlu0 %v1173_v34 }
 0xdc1   :  { %v1172_v3 = vpop.xlane.xlu1 %1171 }
 0xdc2   :  { %v1176_v35 = vmul.f32 0.03125, %v1172_v3 }
 0xdc4   :  { %v1178_v9 = vadd.f32 1e-05, %v1176_v35 }
 0xdc5   :  { %v1175_v27 = vpop.xlane.xlu0 %1174 }
 0xdc6   :  { %1472 = vrsqrt.f32 %v1178_v9  ;;  %v1177_v29 = vmul.f32 0.03125, %v1175_v27 }
 0xdc8   :  { %v1179_v36 = vadd.f32 1e-05, %v1177_v29 }
 0xdca   :  { %1474 = vrsqrt.f32 %v1179_v36 }
 0xdd3   :  { %v1473_v37 = vpop.eup %1472 }
 0xdd4   :  { %v1182_v10 = vmul.f32 %v1473_v37, %v1166_v26 }
 0xdd6   :  { %v1184_v38 = vmul.f32 %v1750_v57, %v1182_v10 }
 0xdd7   :  { %v1475_v39 = vpop.eup %1474 }
 0xdd8   :  { %v1183_v40 = vmul.f32 %v1475_v39, %v1167_v31  ;;  %v1186_v49 = vadd.f32 %v1753_v61, %v1184_v38 }
 0xdda   :  { %v1185_v50 = vmul.f32 %v1750_v57, %v1183_v40  ;;  %v1188_v51 = vsel %vm75_vm1, %v1186_v49, 0.0 }
 0xddb   :  { %1190 = vst [vmem:[#allocation8] sm:$0xff] %v1188_v51 }
 0xddc   :  { %v1187_v52 = vadd.f32 %v1753_v61, %v1185_v50 }
 0xdde   :  { %v1189_v46 = vsel %vm75_vm1, %v1187_v52, 0.0 }
 0xddf   :  { %1191 = vst [vmem:[#allocation8 + $0x8] sm:$0xff] %v1189_v46 }
 0xde0   :  { %1547 = shalt.err (!%p1544_p5)
}
 0xde1   :  { %1203 = dma.vmem_to_hbm [thread:$0]  %s1198_s30, 256, %s1861_s3, [#allocation4], %s1564_s17, %s1564_s17, %s1565_s18  }
 0xde2   :  { %1560 = dma.done.wait [#allocation4], 256  }
 0xde3   :  { %1561 = vsyncadd [#allocation4], 4294967040 }
 0xde4   :  { %1207 = vsyncpa [#allocation3], 1 }
 0xde5   :  { %1208 = vsyncpa [#allocation6], 1 }
 0xde6   :  { %1209 = vsyncpa [#allocation4], 1 }

</bundles_post_ra>
